<compile_context>
chip_gen: v6e
topology: v6e:2x2x1
jax: 0.10.0
libtpu: 0.0.40
codegen_flags: <defaults>
</compile_context>

<pallas_src>
import jax
import jax.numpy as jnp
from jax.experimental import pallas as pl
from jax.experimental.pallas import tpu as pltpu

INPUT_SIZE = 784
ENC_HIDDEN = 256
DEC_HIDDEN = 256
LATENT = 100
LATENT_PAD = 128  # lane-aligned latent width used inside the kernel


def vae_kernel(x_ref, eps_ref,
               w1_ref, b1_ref,
               w2_ref, b2_ref,
               w3_ref, b3_ref,
               w4_ref, b4_ref,
               enc_ref, dec_ref):
    # x arrives as f32 from HBM; cast to bf16 for the MXU here (saves a wrapper HBM pass).
    x = x_ref[...].astype(jnp.bfloat16)

    # encoder: Linear(784 -> 256) + ReLU   (bf16 operands, f32 accumulation on the MXU)
    h1 = jnp.dot(x, w1_ref[...], preferred_element_type=jnp.float32) + b1_ref[...]
    h1 = jnp.maximum(h1, 0.0)

    # fused encoder head: Linear(256 -> 2*128); cols [0:128) = mu, [128:256) = logsigma
    head = jnp.dot(h1.astype(jnp.bfloat16), w2_ref[...],
                   preferred_element_type=jnp.float32) + b2_ref[...]
    mu = head[:, :LATENT_PAD]          # 128-boundary slices: free, no cross-tile copy
    logsigma = head[:, LATENT_PAD:]

    # reparameterization: z = mu + exp(logsigma / 2) * eps
    # (padded lanes stay exactly zero: mu/logsigma pad cols are 0 and eps pad lanes are 0)
    z = mu + jnp.exp(logsigma * 0.5) * eps_ref[...]

    # decoder: Linear(128 -> 256) + ReLU
    h2 = jnp.dot(z.astype(jnp.bfloat16), w3_ref[...],
                 preferred_element_type=jnp.float32) + b3_ref[...]
    h2 = jnp.maximum(h2, 0.0)

    # decoder: Linear(256 -> 784) + Sigmoid, computed as 0.5*tanh(0.5*x)+0.5
    # (single EUP transcendental per element; important on v5e's single non-bf16 EUP)
    logits = jnp.dot(h2.astype(jnp.bfloat16), w4_ref[...],
                     preferred_element_type=jnp.float32) + b4_ref[...]
    dec = 0.5 * jnp.tanh(0.5 * logits) + 0.5

    # fused lane-dense latent output: [mu | logsigma | z] as one (TB, 384) f32 stream
    enc_ref[:, 0:LATENT_PAD] = mu
    enc_ref[:, LATENT_PAD:2 * LATENT_PAD] = logsigma
    enc_ref[:, 2 * LATENT_PAD:3 * LATENT_PAD] = z
    # decoded stored in bf16: halves the largest output stream of a bandwidth-bound kernel
    dec_ref[...] = dec.astype(dec_ref.dtype)


def _prepare_kernel_params(p):
    """Fuse the mu/logsigma head, zero-pad latent dims 100->128, cast matmul weights to bf16."""
    bf = jnp.bfloat16
    w2, b2 = p["w2"], p["b2"]
    w2f = jnp.zeros((ENC_HIDDEN, 2 * LATENT_PAD), jnp.float32)
    w2f = w2f.at[:, :LATENT].set(w2[:, :LATENT])
    w2f = w2f.at[:, LATENT_PAD:LATENT_PAD + LATENT].set(w2[:, LATENT:])
    b2f = jnp.zeros((1, 2 * LATENT_PAD), jnp.float32)
    b2f = b2f.at[:, :LATENT].set(b2[:, :LATENT])
    b2f = b2f.at[:, LATENT_PAD:LATENT_PAD + LATENT].set(b2[:, LATENT:])
    w3p = jnp.zeros((LATENT_PAD, DEC_HIDDEN), jnp.float32).at[:LATENT, :].set(p["w3"])
    return dict(
        w1=p["w1"].astype(bf), b1=p["b1"],
        w2=w2f.astype(bf),     b2=b2f,
        w3=w3p.astype(bf),     b3=p["b3"],
        w4=p["w4"].astype(bf), b4=p["b4"],
    )


def _choose_tile(B, block_b):
    """Batch-tile rows: multiples of 16 (bf16 sublane packing); >=2 grid steps when possible
    so v7x's two TensorCores both get work under dimension_semantics=('parallel',)."""
    if B >= 2 * block_b:
        return block_b
    half = -(-B // 2)                      # ceil(B/2)
    tb = max(16, (-(-half // 16)) * 16)    # round up to multiple of 16
    return min(tb, block_b)


def vae_forward(x, eps, params, *, block_b=512):
    """x: (B, 784) f32, eps: (B, 100) f32.

    Returns (mu, logsigma, z, decoded): mu/logsigma/z in f32, decoded in bfloat16 (cast
    downstream only if f32 reconstruction precision is required).
    """
    B = x.shape[0]
    kp = _prepare_kernel_params(params)

    TB = _choose_tile(B, block_b)
    B_pad = (-(-B // TB)) * TB
    grid = (B_pad // TB,)

    # x: no pad/cast pass when the batch already tiles evenly; otherwise pad the ragged tail only.
    x = x.astype(jnp.float32)
    x_in = x if B_pad == B else jnp.pad(x, ((0, B_pad - B), (0, 0)))

    # eps: lane-pad 100 -> 128 with exact zeros (keeps z's padded lanes exactly zero in-kernel).
    eps_in = jnp.zeros((B_pad, LATENT_PAD), jnp.float32).at[:B, :LATENT].set(eps)

    in_specs = [
        pl.BlockSpec((TB, INPUT_SIZE), lambda i: (i, 0)),              # x (batch-blocked, f32)
        pl.BlockSpec((TB, LATENT_PAD), lambda i: (i, 0)),              # eps (batch-blocked)
        pl.BlockSpec((INPUT_SIZE, ENC_HIDDEN), lambda i: (0, 0)),      # w1 (VMEM-resident)
        pl.BlockSpec((1, ENC_HIDDEN), lambda i: (0, 0)),               # b1
        pl.BlockSpec((ENC_HIDDEN, 2 * LATENT_PAD), lambda i: (0, 0)),  # w2 (fused head)
        pl.BlockSpec((1, 2 * LATENT_PAD), lambda i: (0, 0)),           # b2
        pl.BlockSpec((LATENT_PAD, DEC_HIDDEN), lambda i: (0, 0)),      # w3
        pl.BlockSpec((1, DEC_HIDDEN), lambda i: (0, 0)),               # b3
        pl.BlockSpec((DEC_HIDDEN, INPUT_SIZE), lambda i: (0, 0)),      # w4
        pl.BlockSpec((1, INPUT_SIZE), lambda i: (0, 0)),               # b4
    ]
    out_specs = [
        pl.BlockSpec((TB, 3 * LATENT_PAD), lambda i: (i, 0)),   # fused [mu | logsigma | z]
        pl.BlockSpec((TB, INPUT_SIZE), lambda i: (i, 0)),       # decoded (bf16)
    ]
    out_shapes = (
        jax.ShapeDtypeStruct((B_pad, 3 * LATENT_PAD), jnp.float32),
        jax.ShapeDtypeStruct((B_pad, INPUT_SIZE), jnp.bfloat16),
    )

    flops = 2 * B_pad * (INPUT_SIZE * ENC_HIDDEN + ENC_HIDDEN * 2 * LATENT_PAD
                         + LATENT_PAD * DEC_HIDDEN + DEC_HIDDEN * INPUT_SIZE)
    transcendentals = B_pad * (LATENT_PAD + INPUT_SIZE)  # exp for z, tanh for sigmoid
    bytes_accessed = (x_in.size * 4 + eps_in.size * 4
                      + sum(int(v.size) * v.dtype.itemsize for v in kp.values())
                      + B_pad * 3 * LATENT_PAD * 4       # fused latent output (f32)
                      + B_pad * INPUT_SIZE * 2)          # decoded output (bf16)

    enc, dec = pl.pallas_call(
        vae_kernel,
        grid=grid,
        out_shape=out_shapes,
        in_specs=in_specs,
        out_specs=out_specs,
        compiler_params=pltpu.CompilerParams(
            dimension_semantics=("parallel",),
            vmem_limit_bytes=32 * 1024 * 1024,
        ),
        cost_estimate=pl.CostEstimate(flops=flops,
                                      transcendentals=transcendentals,
                                      bytes_accessed=bytes_accessed),
    )(x_in, eps_in, kp["w1"], kp["b1"], kp["w2"], kp["b2"],
      kp["w3"], kp["b3"], kp["w4"], kp["b4"])

    # slice padded rows / padded latent lanes back to the module's shapes
    mu = enc[:B, 0:LATENT]
    logsigma = enc[:B, LATENT_PAD:LATENT_PAD + LATENT]
    z = enc[:B, 2 * LATENT_PAD:2 * LATENT_PAD + LATENT]
    decoded = dec[:B]   # bf16; downstream casts to f32 only if required
    return mu, logsigma, z, decoded


def init_params(key):
    """Deterministic synthetic parameters with PyTorch nn.Linear init, pre-transposed to (in, out)."""
    ks = jax.random.split(key, 8)

    def lin(kw, kb, fan_in, fan_out):
        bound = 1.0 / jnp.sqrt(fan_in)
        w = jax.random.uniform(kw, (fan_in, fan_out), jnp.float32, -bound, bound)
        b = jax.random.uniform(kb, (1, fan_out), jnp.float32, -bound, bound)
        return w, b

    w1, b1 = lin(ks[0], ks[1], INPUT_SIZE, ENC_HIDDEN)
    w2, b2 = lin(ks[2], ks[3], ENC_HIDDEN, 2 * LATENT)
    w3, b3 = lin(ks[4], ks[5], LATENT, DEC_HIDDEN)
    w4, b4 = lin(ks[6], ks[7], DEC_HIDDEN, INPUT_SIZE)
    return {"w1": w1, "b1": b1, "w2": w2, "b2": b2, "w3": w3, "b3": b3, "w4": w4, "b4": b4}


def vae_reference_f32(x, eps, p):
    h1 = jnp.maximum(x @ p["w1"] + p["b1"], 0.0)
    enc = h1 @ p["w2"] + p["b2"]
    mu, ls = enc[:, :LATENT], enc[:, LATENT:]
    z = mu + jnp.exp(ls / 2.0) * eps
    h2 = jnp.maximum(z @ p["w3"] + p["b3"], 0.0)
    dec = jax.nn.sigmoid(h2 @ p["w4"] + p["b4"])
    return mu, ls, z, dec


def vae_reference_bf16(x, eps, p):
    """Reference that mirrors the kernel's bf16 matmul operands / f32 accumulation."""
    bf, f32 = jnp.bfloat16, jnp.float32

    def mm(a, w):
        return jnp.dot(a.astype(bf), w.astype(bf), preferred_element_type=f32)

    h1 = jnp.maximum(mm(x, p["w1"]) + p["b1"], 0.0)
    enc = mm(h1, p["w2"]) + p["b2"]
    mu, ls = enc[:, :LATENT], enc[:, LATENT:]
    z = mu + jnp.exp(ls * 0.5) * eps
    h2 = jnp.maximum(mm(z, p["w3"]) + p["b3"], 0.0)
    dec = jax.nn.sigmoid(mm(h2, p["w4"]) + p["b4"])
    return mu, ls, z, dec


if __name__ == "__main__":
    key = jax.random.PRNGKey(0)
    k_param, k_x, k_eps = jax.random.split(key, 3)

    B = 8  # small demo batch
    params = init_params(k_param)
    x = jax.random.uniform(k_x, (B, INPUT_SIZE), jnp.float32)   # MNIST-like input in [0, 1)
    eps = jax.random.normal(k_eps, (B, LATENT), jnp.float32)
    # TODO(synk): torch.randn inside encode() is host RNG; here eps is an explicit input for determinism.

    mu, logsigma, z, decoded = jax.block_until_ready(vae_forward(x, eps, params))

    assert mu.shape == (B, LATENT) and logsigma.shape == (B, LATENT)
    assert z.shape == (B, LATENT) and decoded.shape == (B, INPUT_SIZE)
    dec_f32 = decoded.astype(jnp.float32)

    # tight check against a reference using the same bf16 matmul precision
    mu_b, ls_b, z_b, dec_b = vae_reference_bf16(x, eps, params)
    assert jnp.allclose(mu, mu_b, atol=1e-2, rtol=1e-2)
    assert jnp.allclose(logsigma, ls_b, atol=1e-2, rtol=1e-2)
    assert jnp.allclose(z, z_b, atol=1e-2, rtol=1e-2)
    assert jnp.allclose(dec_f32, dec_b, atol=1e-2, rtol=1e-2)

    # looser sanity check against the pure-f32 module semantics
    mu_f, ls_f, z_f, dec_f = vae_reference_f32(x, eps, params)
    assert jnp.allclose(mu, mu_f, atol=3e-2, rtol=3e-2)
    assert jnp.allclose(logsigma, ls_f, atol=3e-2, rtol=3e-2)
    assert jnp.allclose(z, z_f, atol=3e-2, rtol=3e-2)
    assert jnp.allclose(dec_f32, dec_f, atol=3e-2, rtol=3e-2)

    print("KERNEL_OK")
</pallas_src>

<mosaic_0001>
module attributes {stable_mosaic.version = 11 : i64} {
  func.func @vae_kernel(%arg0: i32, %arg1: memref<16x784xf32, #tpu.memory_space<vmem>>, %arg2: memref<16x128xf32, #tpu.memory_space<vmem>>, %arg3: memref<784x256xbf16, #tpu.memory_space<vmem>>, %arg4: memref<1x256xf32, #tpu.memory_space<vmem>>, %arg5: memref<256x256xbf16, #tpu.memory_space<vmem>>, %arg6: memref<1x256xf32, #tpu.memory_space<vmem>>, %arg7: memref<128x256xbf16, #tpu.memory_space<vmem>>, %arg8: memref<1x256xf32, #tpu.memory_space<vmem>>, %arg9: memref<256x784xbf16, #tpu.memory_space<vmem>>, %arg10: memref<1x784xf32, #tpu.memory_space<vmem>>, %arg11: memref<16x384xf32, #tpu.memory_space<vmem>>, %arg12: memref<16x784xbf16, #tpu.memory_space<vmem>>) attributes {dimension_semantics = [#tpu.dimension_semantics<parallel>], iteration_bounds = array<i64: 1>, scalar_prefetch = 0 : i64, scratch_operands = 0 : i64, tpu.core_type = #tpu.core_type<tc>, window_params = [{transform_indices = @transform_0, window_bounds = array<i64: 16, 784>}, {transform_indices = @transform_1, window_bounds = array<i64: 16, 128>}, {pipeline_mode = #tpu.pipeline_mode<synchronous>, transform_indices = @transform_2, window_bounds = array<i64: 784, 256>}, {pipeline_mode = #tpu.pipeline_mode<synchronous>, transform_indices = @transform_3, window_bounds = array<i64: 1, 256>}, {pipeline_mode = #tpu.pipeline_mode<synchronous>, transform_indices = @transform_4, window_bounds = array<i64: 256, 256>}, {pipeline_mode = #tpu.pipeline_mode<synchronous>, transform_indices = @transform_5, window_bounds = array<i64: 1, 256>}, {pipeline_mode = #tpu.pipeline_mode<synchronous>, transform_indices = @transform_6, window_bounds = array<i64: 128, 256>}, {pipeline_mode = #tpu.pipeline_mode<synchronous>, transform_indices = @transform_7, window_bounds = array<i64: 1, 256>}, {pipeline_mode = #tpu.pipeline_mode<synchronous>, transform_indices = @transform_8, window_bounds = array<i64: 256, 784>}, {pipeline_mode = #tpu.pipeline_mode<synchronous>, transform_indices = @transform_9, window_bounds = array<i64: 1, 784>}, {transform_indices = @transform_10, window_bounds = array<i64: 16, 384>}, {transform_indices = @transform_11, window_bounds = array<i64: 16, 784>}]} {
    %c0 = arith.constant 0 : index
    %c0_0 = arith.constant 0 : index
    %0 = vector.load %arg1[%c0, %c0_0] : memref<16x784xf32, #tpu.memory_space<vmem>>, vector<16x784xf32>
    %1 = arith.truncf %0 : vector<16x784xf32> to vector<16x784xbf16>
    %c0_1 = arith.constant 0 : index
    %c0_2 = arith.constant 0 : index
    %2 = vector.load %arg3[%c0_1, %c0_2] : memref<784x256xbf16, #tpu.memory_space<vmem>>, vector<784x256xbf16>
    %cst = arith.constant dense<0.000000e+00> : vector<16x256xf32>
    %3 = tpu.matmul %1, %2, %cst {dimension_numbers = #tpu.dot_dimension_numbers<[1], [0], [0], [1], [0, 0, 1, 1], [], []>} : vector<16x784xbf16>, vector<784x256xbf16>, vector<16x256xf32> -> vector<16x256xf32>
    %c0_3 = arith.constant 0 : index
    %c0_4 = arith.constant 0 : index
    %4 = vector.load %arg4[%c0_3, %c0_4] : memref<1x256xf32, #tpu.memory_space<vmem>>, vector<1x256xf32>
    %5 = vector.broadcast %4 : vector<1x256xf32> to vector<16x256xf32>
    %6 = arith.addf %3, %5 : vector<16x256xf32>
    %cst_5 = arith.constant 0.000000e+00 : f32
    %7 = vector.broadcast %cst_5 : f32 to vector<16x256xf32>
    %8 = arith.maximumf %6, %7 : vector<16x256xf32>
    %9 = arith.truncf %8 : vector<16x256xf32> to vector<16x256xbf16>
    %c0_6 = arith.constant 0 : index
    %c0_7 = arith.constant 0 : index
    %10 = vector.load %arg5[%c0_6, %c0_7] : memref<256x256xbf16, #tpu.memory_space<vmem>>, vector<256x256xbf16>
    %cst_8 = arith.constant dense<0.000000e+00> : vector<16x256xf32>
    %11 = tpu.matmul %9, %10, %cst_8 {dimension_numbers = #tpu.dot_dimension_numbers<[1], [0], [0], [1], [0, 0, 1, 1], [], []>} : vector<16x256xbf16>, vector<256x256xbf16>, vector<16x256xf32> -> vector<16x256xf32>
    %c0_9 = arith.constant 0 : index
    %c0_10 = arith.constant 0 : index
    %12 = vector.load %arg6[%c0_9, %c0_10] : memref<1x256xf32, #tpu.memory_space<vmem>>, vector<1x256xf32>
    %13 = vector.broadcast %12 : vector<1x256xf32> to vector<16x256xf32>
    %14 = arith.addf %11, %13 : vector<16x256xf32>
    %15 = vector.extract_strided_slice %14 {offsets = [0, 0], sizes = [16, 128], strides = [1, 1]} : vector<16x256xf32> to vector<16x128xf32>
    %16 = vector.extract_strided_slice %14 {offsets = [0, 128], sizes = [16, 128], strides = [1, 1]} : vector<16x256xf32> to vector<16x128xf32>
    %cst_11 = arith.constant 5.000000e-01 : f32
    %17 = vector.broadcast %cst_11 : f32 to vector<16x128xf32>
    %18 = arith.mulf %16, %17 : vector<16x128xf32>
    %19 = math.exp %18 : vector<16x128xf32>
    %c0_12 = arith.constant 0 : index
    %c0_13 = arith.constant 0 : index
    %20 = vector.load %arg2[%c0_12, %c0_13] : memref<16x128xf32, #tpu.memory_space<vmem>>, vector<16x128xf32>
    %21 = arith.mulf %19, %20 : vector<16x128xf32>
    %22 = arith.addf %15, %21 : vector<16x128xf32>
    %23 = arith.truncf %22 : vector<16x128xf32> to vector<16x128xbf16>
    %c0_14 = arith.constant 0 : index
    %c0_15 = arith.constant 0 : index
    %24 = vector.load %arg7[%c0_14, %c0_15] : memref<128x256xbf16, #tpu.memory_space<vmem>>, vector<128x256xbf16>
    %cst_16 = arith.constant dense<0.000000e+00> : vector<16x256xf32>
    %25 = tpu.matmul %23, %24, %cst_16 {dimension_numbers = #tpu.dot_dimension_numbers<[1], [0], [0], [1], [0, 0, 1, 1], [], []>} : vector<16x128xbf16>, vector<128x256xbf16>, vector<16x256xf32> -> vector<16x256xf32>
    %c0_17 = arith.constant 0 : index
    %c0_18 = arith.constant 0 : index
    %26 = vector.load %arg8[%c0_17, %c0_18] : memref<1x256xf32, #tpu.memory_space<vmem>>, vector<1x256xf32>
    %27 = vector.broadcast %26 : vector<1x256xf32> to vector<16x256xf32>
    %28 = arith.addf %25, %27 : vector<16x256xf32>
    %cst_19 = arith.constant 0.000000e+00 : f32
    %29 = vector.broadcast %cst_19 : f32 to vector<16x256xf32>
    %30 = arith.maximumf %28, %29 : vector<16x256xf32>
    %31 = arith.truncf %30 : vector<16x256xf32> to vector<16x256xbf16>
    %c0_20 = arith.constant 0 : index
    %c0_21 = arith.constant 0 : index
    %32 = vector.load %arg9[%c0_20, %c0_21] : memref<256x784xbf16, #tpu.memory_space<vmem>>, vector<256x784xbf16>
    %cst_22 = arith.constant dense<0.000000e+00> : vector<16x784xf32>
    %33 = tpu.matmul %31, %32, %cst_22 {dimension_numbers = #tpu.dot_dimension_numbers<[1], [0], [0], [1], [0, 0, 1, 1], [], []>} : vector<16x256xbf16>, vector<256x784xbf16>, vector<16x784xf32> -> vector<16x784xf32>
    %c0_23 = arith.constant 0 : index
    %c0_24 = arith.constant 0 : index
    %34 = vector.load %arg10[%c0_23, %c0_24] : memref<1x784xf32, #tpu.memory_space<vmem>>, vector<1x784xf32>
    %35 = vector.broadcast %34 : vector<1x784xf32> to vector<16x784xf32>
    %36 = arith.addf %33, %35 : vector<16x784xf32>
    %cst_25 = arith.constant 5.000000e-01 : f32
    %37 = vector.broadcast %cst_25 : f32 to vector<16x784xf32>
    %38 = arith.mulf %37, %36 : vector<16x784xf32>
    %39 = math.tanh %38 : vector<16x784xf32>
    %cst_26 = arith.constant 5.000000e-01 : f32
    %40 = vector.broadcast %cst_26 : f32 to vector<16x784xf32>
    %41 = arith.mulf %40, %39 : vector<16x784xf32>
    %cst_27 = arith.constant 5.000000e-01 : f32
    %42 = vector.broadcast %cst_27 : f32 to vector<16x784xf32>
    %43 = arith.addf %41, %42 : vector<16x784xf32>
    %c0_28 = arith.constant 0 : index
    %c0_29 = arith.constant 0 : index
    %44 = vector.load %arg11[%c0_28, %c0_29] : memref<16x384xf32, #tpu.memory_space<vmem>>, vector<16x128xf32>
    tpu.vector_store %arg11[%c0_28, %c0_29], %15 {strides = array<i32>} : memref<16x384xf32, #tpu.memory_space<vmem>>, vector<16x128xf32>,
    %c0_30 = arith.constant 0 : index
    %c128 = arith.constant 128 : index
    %45 = vector.load %arg11[%c0_30, %c128] : memref<16x384xf32, #tpu.memory_space<vmem>>, vector<16x128xf32>
    tpu.vector_store %arg11[%c0_30, %c128], %16 {strides = array<i32>} : memref<16x384xf32, #tpu.memory_space<vmem>>, vector<16x128xf32>,
    %c0_31 = arith.constant 0 : index
    %c256 = arith.constant 256 : index
    %46 = vector.load %arg11[%c0_31, %c256] : memref<16x384xf32, #tpu.memory_space<vmem>>, vector<16x128xf32>
    tpu.vector_store %arg11[%c0_31, %c256], %22 {strides = array<i32>} : memref<16x384xf32, #tpu.memory_space<vmem>>, vector<16x128xf32>,
    %47 = arith.truncf %43 : vector<16x784xf32> to vector<16x784xbf16>
    %c0_32 = arith.constant 0 : index
    %c0_33 = arith.constant 0 : index
    %48 = vector.load %arg12[%c0_32, %c0_33] : memref<16x784xbf16, #tpu.memory_space<vmem>>, vector<16x784xbf16>
    tpu.vector_store %arg12[%c0_32, %c0_33], %47 {strides = array<i32>} : memref<16x784xbf16, #tpu.memory_space<vmem>>, vector<16x784xbf16>,
    return
  }
  func.func @transform_0(%arg0: i32) -> (i32, i32) {
    %c0_i32 = arith.constant 0 : i32
    %c0_i32_0 = arith.constant 0 : i32
    return %arg0, %c0_i32 : i32, i32
  }
  func.func @transform_1(%arg0: i32) -> (i32, i32) {
    %c0_i32 = arith.constant 0 : i32
    %c0_i32_0 = arith.constant 0 : i32
    return %arg0, %c0_i32 : i32, i32
  }
  func.func @transform_2(%arg0: i32) -> (i32, i32) {
    %c0_i32 = arith.constant 0 : i32
    %c0_i32_0 = arith.constant 0 : i32
    %c0_i32_1 = arith.constant 0 : i32
    return %c0_i32, %c0_i32_0 : i32, i32
  }
  func.func @transform_3(%arg0: i32) -> (i32, i32) {
    %c0_i32 = arith.constant 0 : i32
    %c0_i32_0 = arith.constant 0 : i32
    %c0_i32_1 = arith.constant 0 : i32
    return %c0_i32, %c0_i32_0 : i32, i32
  }
  func.func @transform_4(%arg0: i32) -> (i32, i32) {
    %c0_i32 = arith.constant 0 : i32
    %c0_i32_0 = arith.constant 0 : i32
    %c0_i32_1 = arith.constant 0 : i32
    return %c0_i32, %c0_i32_0 : i32, i32
  }
  func.func @transform_5(%arg0: i32) -> (i32, i32) {
    %c0_i32 = arith.constant 0 : i32
    %c0_i32_0 = arith.constant 0 : i32
    %c0_i32_1 = arith.constant 0 : i32
    return %c0_i32, %c0_i32_0 : i32, i32
  }
  func.func @transform_6(%arg0: i32) -> (i32, i32) {
    %c0_i32 = arith.constant 0 : i32
    %c0_i32_0 = arith.constant 0 : i32
    %c0_i32_1 = arith.constant 0 : i32
    return %c0_i32, %c0_i32_0 : i32, i32
  }
  func.func @transform_7(%arg0: i32) -> (i32, i32) {
    %c0_i32 = arith.constant 0 : i32
    %c0_i32_0 = arith.constant 0 : i32
    %c0_i32_1 = arith.constant 0 : i32
    return %c0_i32, %c0_i32_0 : i32, i32
  }
  func.func @transform_8(%arg0: i32) -> (i32, i32) {
    %c0_i32 = arith.constant 0 : i32
    %c0_i32_0 = arith.constant 0 : i32
    %c0_i32_1 = arith.constant 0 : i32
    return %c0_i32, %c0_i32_0 : i32, i32
  }
  func.func @transform_9(%arg0: i32) -> (i32, i32) {
    %c0_i32 = arith.constant 0 : i32
    %c0_i32_0 = arith.constant 0 : i32
    %c0_i32_1 = arith.constant 0 : i32
    return %c0_i32, %c0_i32_0 : i32, i32
  }
  func.func @transform_10(%arg0: i32) -> (i32, i32) {
    %c0_i32 = arith.constant 0 : i32
    %c0_i32_0 = arith.constant 0 : i32
    return %arg0, %c0_i32 : i32, i32
  }
  func.func @transform_11(%arg0: i32) -> (i32, i32) {
    %c0_i32 = arith.constant 0 : i32
    %c0_i32_0 = arith.constant 0 : i32
    return %arg0, %c0_i32 : i32, i32
  }
}

</mosaic_0001>

<bundles_post_ra>
// kernel: tpu_custom_call.1
= control target key start
LH: loop header
LB: loop body
LE: loop exit
PB: predicated region body
PF: predicated region fallthrough
CT: control target
= control target key end

     0   :  { %17 = vsyncpa [#allocation3], 0  ;;  %vm661_vm0 = vcmask 130048   ;;  %s4022_s0 = inlined_call_operand.vmem [shape: f32[16,784], index: 0, kind: input, shape index: {}]   ;;  %s4023_s1 = inlined_call_operand.vmem [shape: f32[16,128], index: 1, kind: input, shape index: {}]   ;;  %s4024_s2 = inlined_call_operand.vmem [shape: bf16[784,256], index: 2, kind: input, shape index: {}]   ;;  %s4025_s3 = inlined_call_operand.vmem [shape: f32[1,256], index: 3, kind: input, shape index: {}]   ;;  %s4026_s4 = inlined_call_operand.vmem [shape: bf16[256,256], index: 4, kind: input, shape index: {}]   ;;  %s4027_s5 = inlined_call_operand.vmem [shape: f32[1,256], index: 5, kind: input, shape index: {}]   ;;  %s4028_s6 = inlined_call_operand.vmem [shape: bf16[128,256], index: 6, kind: input, shape index: {}]   ;;  %s4029_s7 = inlined_call_operand.vmem [shape: f32[1,256], index: 7, kind: input, shape index: {}]   ;;  %s4030_s8 = inlined_call_operand.vmem [shape: bf16[256,784], index: 8, kind: input, shape index: {}]   ;;  %s4031_s9 = inlined_call_operand.vmem [shape: f32[1,784], index: 9, kind: input, shape index: {}]   ;;  %s4032_s10 = inlined_call_operand.hbm [shape: f32[16,384], index: 10, kind: output, shape index: {0}]   ;;  %s4033_s11 = inlined_call_operand.hbm [shape: bf16[16,784], index: 11, kind: output, shape index: {1}]  }
   0x1   :  { %v2622_v0 = vld [vmem:[%s4024_s2 + $0x74] ss:$8 sps:$4 sm:$0xff]   ;;  %v2624_v1 = vld [vmem:[%s4024_s2 + $0x70] ss:$8 sps:$4 sm:$0xff]   ;;  %v2628_v4 = vld [vmem:[%s4024_s2 + $0x64] ss:$8 sps:$4 sm:$0xff]  }
   0x2   :  { %665 = vmatprep.subr.bf16.mxu0 %v2622_v0  ;;  %v2625_v2 = vld [vmem:[%s4024_s2 + $0x174] ss:$8 sps:$4 sm:$0xff]   ;;  %v2627_v3 = vld [vmem:[%s4024_s2 + $0x170] ss:$8 sps:$4 sm:$0xff]   ;;  %v2630_v5 = vld [vmem:[%s4024_s2 + $0x60] ss:$8 sps:$4 sm:$0xff]  }
   0x3   :  { %666 = vmatpush1.bf16.msra.mxu0 %v2624_v1  ;;  %708 = vmatprep.subr.bf16.mxu1 %v2625_v2  ;;  %v2631_v6 = vld [vmem:[%s4024_s2 + $0x164] ss:$8 sps:$4 sm:$0xff]   ;;  %v2633_v7 = vld [vmem:[%s4024_s2 + $0x160] ss:$8 sps:$4 sm:$0xff]   ;;  %v2634_v8 = vld [vmem:[%s4024_s2 + $0x54] ss:$8 sps:$4 sm:$0xff]  }
   0x4   :  { %709 = vmatpush1.bf16.msra.mxu1 %v2627_v3  ;;  %667 = vmatprep.subr.bf16.mxu0 %v2628_v4  ;;  %v2636_v9 = vld [vmem:[%s4024_s2 + $0x50] ss:$8 sps:$4 sm:$0xff]   ;;  %v2637_v10 = vld [vmem:[%s4024_s2 + $0x154] ss:$8 sps:$4 sm:$0xff]   ;;  %v2640_v11 = vld [vmem:[%s4024_s2 + $0x44] ss:$8 sps:$4 sm:$0xff]  }
   0x5   :  { %710 = vmatprep.subr.bf16.mxu1 %v2631_v6  ;;  %v2639_v12 = vld [vmem:[%s4024_s2 + $0x150] ss:$8 sps:$4 sm:$0xff]   ;;  %v2643_v13 = vld [vmem:[%s4024_s2 + $0x144] ss:$8 sps:$4 sm:$0xff]   ;;  %v2642_v14 = vld [vmem:[%s4024_s2 + $0x40] ss:$8 sps:$4 sm:$0xff]  }
   0x6   :  { %v2646_v15 = vld [vmem:[%s4024_s2 + $0x34] ss:$8 sps:$4 sm:$0xff]   ;;  %v2645_v16 = vld [vmem:[%s4024_s2 + $0x140] ss:$8 sps:$4 sm:$0xff]   ;;  %v2648_v18 = vld [vmem:[%s4024_s2 + $0x30] ss:$8 sps:$4 sm:$0xff]  }
   0x7   :  { %668 = vmatpush1.bf16.msra.mxu0 %v2630_v5  ;;  %v2649_v17 = vld [vmem:[%s4024_s2 + $0x134] ss:$8 sps:$4 sm:$0xff]   ;;  %v2652_v19 = vld [vmem:[%s4024_s2 + $0x24] ss:$8 sps:$4 sm:$0xff]   ;;  %v2651_v20 = vld [vmem:[%s4024_s2 + $0x130] ss:$8 sps:$4 sm:$0xff]  }
   0x8   :  { %669 = vmatprep.subr.bf16.mxu0 %v2634_v8  ;;  %711 = vmatpush1.bf16.msra.mxu1 %v2633_v7  ;;  %v2655_v21 = vld [vmem:[%s4024_s2 + $0x124] ss:$8 sps:$4 sm:$0xff]   ;;  %v2654_v22 = vld [vmem:[%s4024_s2 + $0x20] ss:$8 sps:$4 sm:$0xff]   ;;  %v2658_v23 = vld [vmem:[%s4024_s2 + $0x14] ss:$8 sps:$4 sm:$0xff]  }
   0x9   :  { %712 = vmatprep.subr.bf16.mxu1 %v2637_v10  ;;  %v2657_v24 = vld [vmem:[%s4024_s2 + $0x120] ss:$8 sps:$4 sm:$0xff]   ;;  %v2661_v25 = vld [vmem:[%s4024_s2 + $0x114] ss:$8 sps:$4 sm:$0xff]   ;;  %v2660_v26 = vld [vmem:[%s4024_s2 + $0x10] ss:$8 sps:$4 sm:$0xff]  }
   0xa   :  { %v2664_v27 = vld [vmem:[%s4024_s2 + $0x4] ss:$8 sps:$4 sm:$0xff]   ;;  %v2663_v28 = vld [vmem:[%s4024_s2 + $0x110] ss:$8 sps:$4 sm:$0xff]   ;;  %v2666_v30 = vld [vmem:[%s4024_s2] ss:$8 sps:$4 sm:$0xff]  }
   0xb   :  { %670 = vmatpush1.bf16.msra.mxu0 %v2636_v9  ;;  %v2667_v29 = vld [vmem:[%s4024_s2 + $0x104] ss:$8 sps:$4 sm:$0xff]   ;;  %v2670_v31 = vld [vmem:[%s4024_s2 + $0xf4] ss:$8 sps:$4 sm:$0xff]   ;;  %v2669_v32 = vld [vmem:[%s4024_s2 + $0x100] ss:$8 sps:$4 sm:$0xff]  }
   0xc   :  { %671 = vmatprep.subr.bf16.mxu0 %v2640_v11  ;;  %713 = vmatpush1.bf16.msra.mxu1 %v2639_v12  ;;  %v2673_v33 = vld [vmem:[%s4024_s2 + $0x1f4] ss:$8 sps:$4 sm:$0xff]   ;;  %v2672_v34 = vld [vmem:[%s4024_s2 + $0xf0] ss:$8 sps:$4 sm:$0xff]   ;;  %v2676_v35 = vld [vmem:[%s4024_s2 + $0xe4] ss:$8 sps:$4 sm:$0xff]  }
   0xd   :  { %714 = vmatprep.subr.bf16.mxu1 %v2643_v13  ;;  %v2675_v36 = vld [vmem:[%s4024_s2 + $0x1f0] ss:$8 sps:$4 sm:$0xff]   ;;  %v2679_v37 = vld [vmem:[%s4024_s2 + $0x1e4] ss:$8 sps:$4 sm:$0xff]   ;;  %v2678_v38 = vld [vmem:[%s4024_s2 + $0xe0] ss:$8 sps:$4 sm:$0xff]  }
   0xe   :  { %v2682_v39 = vld [vmem:[%s4024_s2 + $0xd4] ss:$8 sps:$4 sm:$0xff]   ;;  %v2681_v40 = vld [vmem:[%s4024_s2 + $0x1e0] ss:$8 sps:$4 sm:$0xff]   ;;  %v2684_v42 = vld [vmem:[%s4024_s2 + $0xd0] ss:$8 sps:$4 sm:$0xff]  }
   0xf   :  { %672 = vmatpush1.bf16.msra.mxu0 %v2642_v14  ;;  %v2685_v41 = vld [vmem:[%s4024_s2 + $0x1d4] ss:$8 sps:$4 sm:$0xff]   ;;  %v2688_v43 = vld [vmem:[%s4024_s2 + $0xc4] ss:$8 sps:$4 sm:$0xff]   ;;  %v2687_v44 = vld [vmem:[%s4024_s2 + $0x1d0] ss:$8 sps:$4 sm:$0xff]  }
  0x10   :  { %673 = vmatprep.subr.bf16.mxu0 %v2646_v15  ;;  %715 = vmatpush1.bf16.msra.mxu1 %v2645_v16  ;;  %v2691_v45 = vld [vmem:[%s4024_s2 + $0x1c4] ss:$8 sps:$4 sm:$0xff]   ;;  %v2690_v48 = vld [vmem:[%s4024_s2 + $0xc0] ss:$8 sps:$4 sm:$0xff]   ;;  %v2694_v50 = vld [vmem:[%s4024_s2 + $0xb4] ss:$8 sps:$4 sm:$0xff]  }
  0x11   :  { %716 = vmatprep.subr.bf16.mxu1 %v2649_v17  ;;  %v41_v46 = vld [vmem:[%s4022_s0 + $0x8] sm:$0xff]  ;;  %v48_v47 = vld [vmem:[%s4022_s0 + $0x40] sm:$0xff]  ;;  %v43_v52 = vld [vmem:[%s4022_s0 + $0x18] sm:$0xff] }
  0x12   :  { %v55_v49 = vpack.c.bf16 %v48_v47, %v41_v46  ;;  %v2693_v51 = vld [vmem:[%s4024_s2 + $0x1c0] ss:$8 sps:$4 sm:$0xff]   ;;  %v50_v53 = vld [vmem:[%s4022_s0 + $0x50] sm:$0xff]  ;;  %v2700_v57 = vld [vmem:[%s4024_s2 + $0xa4] ss:$8 sps:$4 sm:$0xff]  }
  0x13   :  { %674 = vmatpush1.bf16.msra.mxu0 %v2648_v18  ;;  %v2697_v54 = vld [vmem:[%s4024_s2 + $0x1b4] ss:$8 sps:$4 sm:$0xff]   ;;  %v57_v55 = vpack.c.bf16 %v50_v53, %v43_v52  ;;  %v2696_v56 = vld [vmem:[%s4024_s2 + $0xb0] ss:$8 sps:$4 sm:$0xff]   ;;  %v2703_v59 = vld [vmem:[%s4024_s2 + $0x1a4] ss:$8 sps:$4 sm:$0xff]  }
  0x14   :  { %675 = vmatprep.subr.bf16.mxu0 %v2652_v19  ;;  %717 = vmatpush1.bf16.msra.mxu1 %v2651_v20  ;;  %v2699_v58 = vld [vmem:[%s4024_s2 + $0x1b0] ss:$8 sps:$4 sm:$0xff]   ;;  %v2702_v60 = vld [vmem:[%s4024_s2 + $0xa0] ss:$8 sps:$4 sm:$0xff]   ;;  %v2706_v61 = vld [vmem:[%s4024_s2 + $0x94] ss:$8 sps:$4 sm:$0xff]  }
  0x15   :  { %718 = vmatprep.subr.bf16.mxu1 %v2655_v21  ;;  %697 = vmatprep.mubr.bf16.mxu0 %v55_v49  ;;  %v2705_v62 = vld [vmem:[%s4024_s2 + $0x1a0] ss:$8 sps:$4 sm:$0xff]   ;;  %v2709_v63 = vld [vmem:[%s4024_s2 + $0x194] ss:$8 sps:$4 sm:$0xff]   ;;  %v2708_v0 = vld [vmem:[%s4024_s2 + $0x90] ss:$8 sps:$4 sm:$0xff]  }
  0x16   :  { %740 = vmatprep.mubr.bf16.mxu1 %v57_v55  ;;  %v2711_v1 = vld [vmem:[%s4024_s2 + $0x190] ss:$8 sps:$4 sm:$0xff]   ;;  %v2712_v2 = vld [vmem:[%s4024_s2 + $0x84] ss:$8 sps:$4 sm:$0xff]   ;;  %v2714_v3 = vld [vmem:[%s4024_s2 + $0x80] ss:$8 sps:$4 sm:$0xff]  }
  0x17   :  { %676 = vmatpush1.bf16.msra.mxu0 %v2654_v22  ;;  %v2715_v4 = vld [vmem:[%s4024_s2 + $0x184] ss:$8 sps:$4 sm:$0xff]   ;;  %v2717_v6 = vld [vmem:[%s4024_s2 + $0x180] ss:$8 sps:$4 sm:$0xff]   ;;  %v47_v7 = vld [vmem:[%s4022_s0 + $0x38] sm:$0xff]  ;;  %v3077_v21 = vmov 0  }
  0x18   :  { %677 = vmatprep.subr.bf16.mxu0 %v2658_v23  ;;  %719 = vmatpush1.bf16.msra.mxu1 %v2657_v24  ;;  %v40_v5 = vld [vmem:[%s4022_s0] sm:$0xff]  ;;  %v2720_v8 = vld [vmem:[%s4024_s2 + $0x274] ss:$8 sps:$4 sm:$0xff]   ;;  %v49_v10 = vld [vmem:[%s4022_s0 + $0x48] sm:$0xff] }
  0x19   :  { %720 = vmatprep.subr.bf16.mxu1 %v2661_v25  ;;  %v42_v9 = vld [vmem:[%s4022_s0 + $0x10] sm:$0xff]  ;;  %v54_v11 = vpack.c.bf16 %v47_v7, %v40_v5  ;;  %v2723_v14 = vld [vmem:[%s4024_s2 + $0x264] ss:$8 sps:$4 sm:$0xff]   ;;  %v2763_v15 = vld [vmem:[%s4024_s2 + $0x300] ss:$8 sps:$4 sm:$0xff]  }
  0x1a   :  { %v2718_v12 = vld [vmem:[%s4024_s2 + $0x270] ss:$8 sps:$4 sm:$0xff]   ;;  %v56_v13 = vpack.c.bf16 %v49_v10, %v42_v9  ;;  %v2765_v16 = vld [vmem:[%s4024_s2 + $0x304] ss:$8 sps:$4 sm:$0xff]   ;;  %v2721_v17 = vld [vmem:[%s4024_s2 + $0x260] ss:$8 sps:$4 sm:$0xff]  }
  0x1b   :  { %678 = vmatpush1.bf16.msra.mxu0 %v2660_v26  ;;  %v2726_v18 = vld [vmem:[%s4024_s2 + $0x254] ss:$8 sps:$4 sm:$0xff]   ;;  %v45_v19 = vld [vmem:[%s4022_s0 + $0x28] sm:$0xff]  ;;  %v2724_v20 = vld [vmem:[%s4024_s2 + $0x250] ss:$8 sps:$4 sm:$0xff]  }
  0x1c   :  { %679 = vmatprep.subr.bf16.mxu0 %v2664_v27  ;;  %721 = vmatpush1.bf16.msra.mxu1 %v2663_v28  ;;  %v46_v22 = vld [vmem:[%s4022_s0 + $0x30] sm:$0xff]  ;;  %v53_v23 = vld [vmem:[%s4022_s0 + $0x68] sm:$0xff]  ;;  %v52_v24 = vld [vmem:[%s4022_s0 + $0x60] sm:$0xff] }
  0x1d   :  { %722 = vmatprep.subr.bf16.mxu1 %v2667_v29  ;;  %v2729_v25 = vld [vmem:[%s4024_s2 + $0x244] ss:$8 sps:$4 sm:$0xff]   ;;  %v59_v26 = vpack.c.bf16 %v52_v24, %v45_v19  ;;  %v60_v27 = vpack.c.bf16 %v53_v23, %v46_v22  ;;  %v2727_v28 = vld [vmem:[%s4024_s2 + $0x240] ss:$8 sps:$4 sm:$0xff]   ;;  %v2732_v29 = vld [vmem:[%s4024_s2 + $0x234] ss:$8 sps:$4 sm:$0xff]  }
  0x1e   :  { %v2754_v46 = vld [vmem:[%s4024_s2 + $0x2b0] ss:$8 sps:$4 sm:$0xff]   ;;  %v2759_v47 = vld [vmem:[%s4024_s2 + $0x2a4] ss:$8 sps:$4 sm:$0xff]   ;;  %v2762_v49 = vld [vmem:[%s4024_s2 + $0x294] ss:$8 sps:$4 sm:$0xff]  }
  0x1f   :  { %680 = vmatpush1.bf16.msra.mxu0 %v2666_v30  ;;  %v2730_v30 = vld [vmem:[%s4024_s2 + $0x230] ss:$8 sps:$4 sm:$0xff]   ;;  %v2766_v52 = vld [vmem:[%s4024_s2 + $0x280] ss:$8 sps:$4 sm:$0xff]  }
  0x20   :  { %681 = vmatprep.subr.bf16.mxu0 %v2670_v31  ;;  %723 = vmatpush1.bf16.msra.mxu1 %v2669_v32  ;;  %v2735_v31 = vld [vmem:[%s4024_s2 + $0x224] ss:$8 sps:$4 sm:$0xff]   ;;  %v2733_v32 = vld [vmem:[%s4024_s2 + $0x220] ss:$8 sps:$4 sm:$0xff]  }
  0x21   :  { %724 = vmatprep.subr.bf16.mxu1 %v2673_v33  ;;  %v2738_v33 = vld [vmem:[%s4024_s2 + $0x214] ss:$8 sps:$4 sm:$0xff]   ;;  %v44_v53 = vld [vmem:[%s4022_s0 + $0x20] sm:$0xff] }
  0x23   :  { %682 = vmatpush2.bf16.msra.mxu0 %v2672_v34  ;;  %v2736_v34 = vld [vmem:[%s4024_s2 + $0x210] ss:$8 sps:$4 sm:$0xff]  }
  0x24   :  { %683 = vmatprep.subr.bf16.mxu0 %v2676_v35  ;;  %725 = vmatpush2.bf16.msra.mxu1 %v2675_v36  ;;  %v2741_v35 = vld [vmem:[%s4024_s2 + $0x204] ss:$8 sps:$4 sm:$0xff]   ;;  %v2739_v36 = vld [vmem:[%s4024_s2 + $0x200] ss:$8 sps:$4 sm:$0xff]  }
  0x25   :  { %726 = vmatprep.subr.bf16.mxu1 %v2679_v37  ;;  %v2744_v37 = vld [vmem:[%s4024_s2 + $0x2f4] ss:$8 sps:$4 sm:$0xff]  }
  0x27   :  { %684 = vmatpush2.bf16.msra.mxu0 %v2678_v38  ;;  %v2742_v38 = vld [vmem:[%s4024_s2 + $0x2f0] ss:$8 sps:$4 sm:$0xff]  }
  0x28   :  { %685 = vmatprep.subr.bf16.mxu0 %v2682_v39  ;;  %727 = vmatpush2.bf16.msra.mxu1 %v2681_v40  ;;  %v2747_v39 = vld [vmem:[%s4024_s2 + $0x2e4] ss:$8 sps:$4 sm:$0xff]   ;;  %v2745_v40 = vld [vmem:[%s4024_s2 + $0x2e0] ss:$8 sps:$4 sm:$0xff]  }
  0x29   :  { %728 = vmatprep.subr.bf16.mxu1 %v2685_v41  ;;  %v2750_v41 = vld [vmem:[%s4024_s2 + $0x2d4] ss:$8 sps:$4 sm:$0xff]  }
  0x2b   :  { %686 = vmatpush2.bf16.msra.mxu0 %v2684_v42  ;;  %v2748_v42 = vld [vmem:[%s4024_s2 + $0x2d0] ss:$8 sps:$4 sm:$0xff]  }
  0x2c   :  { %687 = vmatprep.subr.bf16.mxu0 %v2688_v43  ;;  %729 = vmatpush2.bf16.msra.mxu1 %v2687_v44  ;;  %v2753_v43 = vld [vmem:[%s4024_s2 + $0x2c4] ss:$8 sps:$4 sm:$0xff]   ;;  %v2751_v44 = vld [vmem:[%s4024_s2 + $0x2c0] ss:$8 sps:$4 sm:$0xff]  }
  0x2d   :  { %730 = vmatprep.subr.bf16.mxu1 %v2691_v45  ;;  %v2756_v45 = vld [vmem:[%s4024_s2 + $0x2b4] ss:$8 sps:$4 sm:$0xff]  }
  0x2f   :  { %688 = vmatpush2.bf16.msra.mxu0 %v2690_v48  ;;  %v2757_v48 = vld [vmem:[%s4024_s2 + $0x2a0] ss:$8 sps:$4 sm:$0xff]  }
  0x30   :  { %689 = vmatprep.subr.bf16.mxu0 %v2694_v50  ;;  %731 = vmatpush2.bf16.msra.mxu1 %v2693_v51  ;;  %v2760_v50 = vld [vmem:[%s4024_s2 + $0x290] ss:$8 sps:$4 sm:$0xff]   ;;  %v2768_v51 = vld [vmem:[%s4024_s2 + $0x284] ss:$8 sps:$4 sm:$0xff]  }
  0x31   :  { %732 = vmatprep.subr.bf16.mxu1 %v2697_v54  ;;  %v51_v54 = vld [vmem:[%s4022_s0 + $0x58] sm:$0xff] }
  0x32   :  { %v58_v55 = vpack.c.bf16 %v51_v54, %v44_v53 }
  0x33   :  { %690 = vmatpush2.bf16.msra.mxu0 %v2696_v56 }
  0x34   :  { %691 = vmatprep.subr.bf16.mxu0 %v2700_v57  ;;  %733 = vmatpush2.bf16.msra.mxu1 %v2699_v58 }
  0x35   :  { %734 = vmatprep.subr.bf16.mxu1 %v2703_v59 }
  0x37   :  { %692 = vmatpush2.bf16.msra.mxu0 %v2702_v60 }
  0x38   :  { %693 = vmatprep.subr.bf16.mxu0 %v2706_v61  ;;  %735 = vmatpush2.bf16.msra.mxu1 %v2705_v62 }
  0x39   :  { %736 = vmatprep.subr.bf16.mxu1 %v2709_v63 }
  0x3b   :  { %694 = vmatpush2.bf16.msra.mxu0 %v2708_v0 }
  0x3c   :  { %695 = vmatprep.subr.bf16.mxu0 %v2712_v2  ;;  %737 = vmatpush2.bf16.msra.mxu1 %v2711_v1 }
  0x3d   :  { %738 = vmatprep.subr.bf16.mxu1 %v2715_v4 }
  0x3f   :  { %696 = vmatpush2.bf16.msra.mxu0 %v2714_v3 }
  0x40   :  { %751 = vmatprep.subr.bf16.mxu0 %v2720_v8  ;;  %739 = vmatpush2.bf16.msra.mxu1 %v2717_v6 }
  0x41   :  { %808 = vmatprep.subr.bf16.mxu1 %v2765_v16 }
  0x42   :  { %698 = vmatmul.mubr.bf16.vlgmr.msra.gmra.mxu0 %v54_v11 }
  0x43   :  { %752 = vmatpush1.bf16.msra.mxu0 %v2718_v12  ;;  %741 = vmatmul.mubr.bf16.vlgmr.msra.gmra.mxu1 %v56_v13 }
  0x44   :  { %753 = vmatprep.subr.bf16.mxu0 %v2723_v14  ;;  %826 = vmatprep.mubr.bf16.mxu1 %v3077_v21 }
  0x45   :  { %809 = vmatpush1.bf16.msra.mxu1 %v2763_v15  ;;  %783 = vmatprep.mubr.bf16.mxu0 %v59_v26 }
  0x47   :  { %754 = vmatpush1.bf16.msra.mxu0 %v2721_v17 }
  0x48   :  { %755 = vmatprep.subr.bf16.mxu0 %v2726_v18 }
  0x4b   :  { %756 = vmatpush1.bf16.msra.mxu0 %v2724_v20  ;;  %2416 = vmatmul.mubr.msk.bf16.vlgmr.msra.gmra.mxu1 %vm661_vm0, %v60_v27 }
  0x4c   :  { %757 = vmatprep.subr.bf16.mxu0 %v2729_v25 }
  0x4f   :  { %758 = vmatpush1.bf16.msra.mxu0 %v2727_v28 }
  0x50   :  { %759 = vmatprep.subr.bf16.mxu0 %v2732_v29 }
  0x53   :  { %760 = vmatpush1.bf16.msra.mxu0 %v2730_v30 }
  0x54   :  { %761 = vmatprep.subr.bf16.mxu0 %v2735_v31 }
  0x57   :  { %762 = vmatpush1.bf16.msra.mxu0 %v2733_v32 }
  0x58   :  { %763 = vmatprep.subr.bf16.mxu0 %v2738_v33 }
  0x5b   :  { %764 = vmatpush1.bf16.msra.mxu0 %v2736_v34 }
  0x5c   :  { %765 = vmatprep.subr.bf16.mxu0 %v2741_v35 }
  0x5f   :  { %766 = vmatpush1.bf16.msra.mxu0 %v2739_v36 }
  0x60   :  { %767 = vmatprep.subr.bf16.mxu0 %v2744_v37 }
  0x63   :  { %768 = vmatpush2.bf16.msra.mxu0 %v2742_v38 }
  0x64   :  { %769 = vmatprep.subr.bf16.mxu0 %v2747_v39 }
  0x67   :  { %770 = vmatpush2.bf16.msra.mxu0 %v2745_v40 }
  0x68   :  { %771 = vmatprep.subr.bf16.mxu0 %v2750_v41 }
  0x6b   :  { %772 = vmatpush2.bf16.msra.mxu0 %v2748_v42 }
  0x6c   :  { %773 = vmatprep.subr.bf16.mxu0 %v2753_v43 }
  0x6f   :  { %774 = vmatpush2.bf16.msra.mxu0 %v2751_v44 }
  0x70   :  { %775 = vmatprep.subr.bf16.mxu0 %v2756_v45 }
  0x73   :  { %776 = vmatpush2.bf16.msra.mxu0 %v2754_v46 }
  0x74   :  { %777 = vmatprep.subr.bf16.mxu0 %v2759_v47 }
  0x77   :  { %778 = vmatpush2.bf16.msra.mxu0 %v2757_v48 }
  0x78   :  { %779 = vmatprep.subr.bf16.mxu0 %v2762_v49 }
  0x7b   :  { %780 = vmatpush2.bf16.msra.mxu0 %v2760_v50 }
  0x7c   :  { %781 = vmatprep.subr.bf16.mxu0 %v2768_v51 }
  0x7f   :  { %782 = vmatpush2.bf16.msra.mxu0 %v2766_v52 }
  0x80   :  { %18 = vsyncpa [#allocation5], 0  ;;  %v2769_v56 = vld [vmem:[%s4026_s4 + $0x70] ss:$8 sps:$4 sm:$0xff]   ;;  %v2771_v57 = vld [vmem:[%s4026_s4 + $0x74] ss:$8 sps:$4 sm:$0xff]   ;;  %v161_v24 = vlaneseq }
  0x81   :  { %v2774_v58 = vld [vmem:[%s4026_s4 + $0x64] ss:$8 sps:$4 sm:$0xff]   ;;  %1047 = vmatprep.subr.bf16.mxu1 %v2771_v57  ;;  %v2772_v59 = vld [vmem:[%s4026_s4 + $0x60] ss:$8 sps:$4 sm:$0xff]   ;;  %v2777_v60 = vld [vmem:[%s4026_s4 + $0x54] ss:$8 sps:$4 sm:$0xff]  }
  0x82   :  { %784 = vmatmul.mubr.bf16.vlgmr.msra.gmra.mxu0 %v58_v55  ;;  %1048 = vmatpush1.bf16.msra.mxu1 %v2769_v56  ;;  %v2775_v61 = vld [vmem:[%s4026_s4 + $0x50] ss:$8 sps:$4 sm:$0xff]   ;;  %v2780_v62 = vld [vmem:[%s4026_s4 + $0x44] ss:$8 sps:$4 sm:$0xff]   ;;  %v2778_v63 = vld [vmem:[%s4026_s4 + $0x40] ss:$8 sps:$4 sm:$0xff]  }
  0x83   :  { %1243 = vmatprep.mubr.bf16.mxu0 %v3077_v21  ;;  %1049 = vmatprep.subr.bf16.mxu1 %v2774_v58  ;;  %v2783_v0 = vld [vmem:[%s4026_s4 + $0x34] ss:$8 sps:$4 sm:$0xff]   ;;  %v2781_v1 = vld [vmem:[%s4026_s4 + $0x30] ss:$8 sps:$4 sm:$0xff]   ;;  %v2786_v2 = vld [vmem:[%s4026_s4 + $0x24] ss:$8 sps:$4 sm:$0xff]  }
  0x84   :  { %v2784_v3 = vld [vmem:[%s4026_s4 + $0x20] ss:$8 sps:$4 sm:$0xff]   ;;  %v2789_v4 = vld [vmem:[%s4026_s4 + $0x14] ss:$8 sps:$4 sm:$0xff]   ;;  %v2787_v5 = vld [vmem:[%s4026_s4 + $0x10] ss:$8 sps:$4 sm:$0xff]  }
  0x85   :  { %v2792_v6 = vld [vmem:[%s4026_s4 + $0x4] ss:$8 sps:$4 sm:$0xff]   ;;  %v2790_v7 = vld [vmem:[%s4026_s4] ss:$8 sps:$4 sm:$0xff]   ;;  %v2795_v8 = vld [vmem:[%s4026_s4 + $0xf4] ss:$8 sps:$4 sm:$0xff]  }
  0x86   :  { %1050 = vmatpush1.bf16.msra.mxu1 %v2772_v59  ;;  %v2793_v9 = vld [vmem:[%s4026_s4 + $0xf0] ss:$8 sps:$4 sm:$0xff]   ;;  %v2798_v10 = vld [vmem:[%s4026_s4 + $0xe4] ss:$8 sps:$4 sm:$0xff]   ;;  %v2796_v11 = vld [vmem:[%s4026_s4 + $0xe0] ss:$8 sps:$4 sm:$0xff]  }
  0x87   :  { %1051 = vmatprep.subr.bf16.mxu1 %v2777_v60  ;;  %v2801_v12 = vld [vmem:[%s4026_s4 + $0xd4] ss:$8 sps:$4 sm:$0xff]   ;;  %v2799_v13 = vld [vmem:[%s4026_s4 + $0xd0] ss:$8 sps:$4 sm:$0xff]   ;;  %v2804_v14 = vld [vmem:[%s4026_s4 + $0xc4] ss:$8 sps:$4 sm:$0xff]  }
  0x88   :  { %v2802_v15 = vld [vmem:[%s4026_s4 + $0xc0] ss:$8 sps:$4 sm:$0xff]   ;;  %v2807_v16 = vld [vmem:[%s4026_s4 + $0xb4] ss:$8 sps:$4 sm:$0xff]   ;;  %v2805_v17 = vld [vmem:[%s4026_s4 + $0xb0] ss:$8 sps:$4 sm:$0xff]  }
  0x89   :  { %v2810_v18 = vld [vmem:[%s4026_s4 + $0xa4] ss:$8 sps:$4 sm:$0xff]   ;;  %v2808_v19 = vld [vmem:[%s4026_s4 + $0xa0] ss:$8 sps:$4 sm:$0xff]   ;;  %v2813_v20 = vld [vmem:[%s4026_s4 + $0x94] ss:$8 sps:$4 sm:$0xff]  }
  0x8a   :  { %1052 = vmatpush1.bf16.msra.mxu1 %v2775_v61  ;;  %v2811_v21 = vld [vmem:[%s4026_s4 + $0x90] ss:$8 sps:$4 sm:$0xff]   ;;  %v2816_v22 = vld [vmem:[%s4026_s4 + $0x84] ss:$8 sps:$4 sm:$0xff]   ;;  %v2814_v23 = vld [vmem:[%s4026_s4 + $0x80] ss:$8 sps:$4 sm:$0xff]  }
  0x8b   :  { %1053 = vmatprep.subr.bf16.mxu1 %v2780_v62  ;;  %v3578_v26 = vshrl.u32 %v161_v24, 7  ;;  %v159_v30 = vld [vmem:[%s4025_s3] sm:$0x3]  ;;  %v2849_v24 = vld [vmem:[%s4030_s8 + $0x154] ss:$28 sps:$4 sm:$0xff]   ;;  %s3078_s19 = smov [#allocation2]  }
  0x8c   :  { %s2291_s20 = sshll.u32 %s3078_s19, 4  ;;  %s2292_s20 = int_to_ptr.vmem [resolvable:$true] %s2291_s20 }
  0x8d   :  { %v3581_v29 = vsub.s32 1, %v3578_v26  ;;  %v3587_v31 = vsub.s32 0, %v3578_v26  ;;  %s3033_s21 = scalar_lea.vmem %s2292_s20, 768  ;;  %p3038_p1 = scmp.lt.s32.totalorder %s2292_s20, %s2292_s20 }
  0x8e   :  { %1054 = vmatpush1.bf16.msra.mxu1 %v2778_v63  ;;  %p3034_p0 = scmp.ne.s32.totalorder %s2292_s20, %s3033_s21  ;;  %p3039_p2 = scmp.lt.s32.totalorder %s3033_s21, %s3033_s21 }
  0x8f   :  { %1055 = vmatprep.subr.bf16.mxu1 %v2783_v0  ;;  %v168_v34 = vrot.slane %v159_v30, %v3581_v29  ;;  %v164_v35 = vrot.slane %v159_v30, %v3587_v31  ;;  %v2861_v30 = vld [vmem:[%s4030_s8 + $0xe4] ss:$28 sps:$4 sm:$0xff]  }
  0x90   :  { %p3040_p3 = por %p3039_p2, %p3038_p1 }
  0x92   :  { %1056 = vmatpush1.bf16.msra.mxu1 %v2781_v1  ;;  %p3041_p4 = pnand %p3040_p3, %p3034_p0 }
  0x93   :  { %1057 = vmatprep.subr.bf16.mxu1 %v2786_v2 }
  0x96   :  { %1058 = vmatpush1.bf16.msra.mxu1 %v2784_v3 }
  0x97   :  { %1059 = vmatprep.subr.bf16.mxu1 %v2789_v4 }
  0x9a   :  { %1060 = vmatpush1.bf16.msra.mxu1 %v2787_v5  ;;  %v2819_v5 = vld [vmem:[%s4028_s6 + $0x74] ss:$8 sps:$4 sm:$0xff]  }
  0x9b   :  { %1061 = vmatprep.subr.bf16.mxu1 %v2792_v6  ;;  %v2817_v6 = vld [vmem:[%s4028_s6 + $0x70] ss:$8 sps:$4 sm:$0xff]   ;;  %1211 = vmatprep.subr.bf16.mxu0 %v2819_v5  ;;  %v1097_v5 = vld [vmem:[%s4023_s1 + $0x8] sm:$0xff] }
  0x9c   :  { %1212 = vmatpush1.bf16.msra.mxu0 %v2817_v6 }
  0x9e   :  { %1062 = vmatpush1.bf16.msra.mxu1 %v2790_v7  ;;  %v2822_v7 = vld [vmem:[%s4028_s6 + $0x64] ss:$8 sps:$4 sm:$0xff]  }
  0x9f   :  { %1063 = vmatprep.subr.bf16.mxu1 %v2795_v8  ;;  %v2820_v8 = vld [vmem:[%s4028_s6 + $0x60] ss:$8 sps:$4 sm:$0xff]   ;;  %1213 = vmatprep.subr.bf16.mxu0 %v2822_v7 }
  0xa0   :  { %1214 = vmatpush1.bf16.msra.mxu0 %v2820_v8 }
  0xa2   :  { %1064 = vmatpush2.bf16.msra.mxu1 %v2793_v9  ;;  %v2825_v9 = vld [vmem:[%s4028_s6 + $0x54] ss:$8 sps:$4 sm:$0xff]  }
  0xa3   :  { %1065 = vmatprep.subr.bf16.mxu1 %v2798_v10  ;;  %v2823_v10 = vld [vmem:[%s4028_s6 + $0x50] ss:$8 sps:$4 sm:$0xff]   ;;  %1215 = vmatprep.subr.bf16.mxu0 %v2825_v9 }
  0xa4   :  { %1216 = vmatpush1.bf16.msra.mxu0 %v2823_v10  ;;  %v2844_v10 = vld [vmem:[%s4030_s8 + $0x190] ss:$28 sps:$4 sm:$0xff]  }
  0xa6   :  { %1066 = vmatpush2.bf16.msra.mxu1 %v2796_v11  ;;  %v2828_v11 = vld [vmem:[%s4028_s6 + $0x44] ss:$8 sps:$4 sm:$0xff]  }
  0xa7   :  { %1067 = vmatprep.subr.bf16.mxu1 %v2801_v12  ;;  %v2826_v12 = vld [vmem:[%s4028_s6 + $0x40] ss:$8 sps:$4 sm:$0xff]   ;;  %1217 = vmatprep.subr.bf16.mxu0 %v2828_v11 }
  0xa8   :  { %1218 = vmatpush1.bf16.msra.mxu0 %v2826_v12  ;;  %v2852_v12 = vld [vmem:[%s4030_s8 + $0x15c] ss:$28 sps:$4 sm:$0xff]  }
  0xaa   :  { %1068 = vmatpush2.bf16.msra.mxu1 %v2799_v13  ;;  %v2831_v13 = vld [vmem:[%s4028_s6 + $0x34] ss:$8 sps:$4 sm:$0xff]  }
  0xab   :  { %1069 = vmatprep.subr.bf16.mxu1 %v2804_v14  ;;  %v2829_v14 = vld [vmem:[%s4028_s6 + $0x30] ss:$8 sps:$4 sm:$0xff]   ;;  %1219 = vmatprep.subr.bf16.mxu0 %v2831_v13 }
  0xac   :  { %1220 = vmatpush1.bf16.msra.mxu0 %v2829_v14  ;;  %v2850_v13 = vld [vmem:[%s4030_s8 + $0x158] ss:$28 sps:$4 sm:$0xff]   ;;  %v2858_v14 = vld [vmem:[%s4030_s8 + $0x124] ss:$28 sps:$4 sm:$0xff]  }
  0xae   :  { %1070 = vmatpush2.bf16.msra.mxu1 %v2802_v15  ;;  %v2834_v15 = vld [vmem:[%s4028_s6 + $0x24] ss:$8 sps:$4 sm:$0xff]  }
  0xaf   :  { %1071 = vmatprep.subr.bf16.mxu1 %v2807_v16  ;;  %v2832_v16 = vld [vmem:[%s4028_s6 + $0x20] ss:$8 sps:$4 sm:$0xff]   ;;  %1221 = vmatprep.subr.bf16.mxu0 %v2834_v15 }
  0xb0   :  { %1222 = vmatpush1.bf16.msra.mxu0 %v2832_v16  ;;  %v2856_v15 = vld [vmem:[%s4030_s8 + $0x120] ss:$28 sps:$4 sm:$0xff]   ;;  %v2864_v16 = vld [vmem:[%s4030_s8 + $0xec] ss:$28 sps:$4 sm:$0xff]  }
  0xb2   :  { %1072 = vmatpush2.bf16.msra.mxu1 %v2805_v17  ;;  %v2837_v17 = vld [vmem:[%s4028_s6 + $0x14] ss:$8 sps:$4 sm:$0xff]  }
  0xb3   :  { %1073 = vmatprep.subr.bf16.mxu1 %v2810_v18  ;;  %v2835_v18 = vld [vmem:[%s4028_s6 + $0x10] ss:$8 sps:$4 sm:$0xff]   ;;  %1223 = vmatprep.subr.bf16.mxu0 %v2837_v17  ;;  %v2862_v17 = vld [vmem:[%s4030_s8 + $0xe8] ss:$28 sps:$4 sm:$0xff]  }
  0xb4   :  { %1224 = vmatpush1.bf16.msra.mxu0 %v2835_v18  ;;  %v2870_v18 = vld [vmem:[%s4030_s8 + $0xb4] ss:$28 sps:$4 sm:$0xff]  }
  0xb6   :  { %1074 = vmatpush2.bf16.msra.mxu1 %v2808_v19  ;;  %v2840_v19 = vld [vmem:[%s4028_s6 + $0x4] ss:$8 sps:$4 sm:$0xff]  }
  0xb7   :  { %1075 = vmatprep.subr.bf16.mxu1 %v2813_v20  ;;  %v2838_v20 = vld [vmem:[%s4028_s6] ss:$8 sps:$4 sm:$0xff]   ;;  %1225 = vmatprep.subr.bf16.mxu0 %v2840_v19  ;;  %v2868_v19 = vld [vmem:[%s4030_s8 + $0xb0] ss:$28 sps:$4 sm:$0xff]  }
  0xb8   :  { %1226 = vmatpush1.bf16.msra.mxu0 %v2838_v20  ;;  %v2876_v20 = vld [vmem:[%s4030_s8 + $0x7c] ss:$28 sps:$4 sm:$0xff]  }
  0xba   :  { %1076 = vmatpush2.bf16.msra.mxu1 %v2811_v21  ;;  %v2841_v21 = vld [vmem:[%s4030_s8 + $0x188] ss:$28 sps:$4 sm:$0xff]  }
  0xbb   :  { %1077 = vmatprep.subr.bf16.mxu1 %v2816_v22  ;;  %v2843_v22 = vld [vmem:[%s4030_s8 + $0x18c] ss:$28 sps:$4 sm:$0xff]  }
  0xbe   :  { %1078 = vmatpush2.bf16.msra.mxu1 %v2814_v23  ;;  %v2846_v23 = vld [vmem:[%s4030_s8 + $0x194] ss:$28 sps:$4 sm:$0xff]  }
  0xbf   :  { %2001 = vmatprep.subr.bf16.mxu1 %v2843_v22  ;;  %2044 = vmatprep.subr.bf16.mxu0 %v2846_v23  ;;  %v2882_v22 = vld [vmem:[%s4030_s8 + $0x44] ss:$28 sps:$4 sm:$0xff]  }
  0xc0   :  { %v2880_v23 = vld [vmem:[%s4030_s8 + $0x40] ss:$28 sps:$4 sm:$0xff]  }
 0x102   :  { %v699_v27 = vpop.f32.mrf.mxu0 }
 0x103   :  { %v742_v25 = vpop.f32.mrf.mxu1  ;;  %v700_v40 = vadd.f32 %v699_v27, %v164_v35  ;;  %v2855_v27 = vld [vmem:[%s4030_s8 + $0x11c] ss:$28 sps:$4 sm:$0xff]  }
 0x104   :  { %v701_v32 = vpop.f32.mrf.mxu0 }
 0x105   :  { %v744_v28 = vpop.f32.mrf.mxu1  ;;  %v702_v39 = vadd.f32 %v701_v32, %v168_v34  ;;  %v743_v47 = vadd.f32 %v742_v25, %v700_v40  ;;  %v2847_v25 = vld [vmem:[%s4030_s8 + $0x150] ss:$28 sps:$4 sm:$0xff]   ;;  %v2859_v32 = vld [vmem:[%s4030_s8 + $0xe0] ss:$28 sps:$4 sm:$0xff]  }
 0x106   :  { %v703_v36 = vpop.f32.mrf.mxu0  ;;  %v2883_v40 = vld [vmem:[%s4030_s8] ss:$28 sps:$4 sm:$0xff]  }
 0x107   :  { %v746_v33 = vpop.f32.mrf.mxu1  ;;  %v704_v42 = vadd.f32 %v703_v36, %v164_v35  ;;  %v745_v45 = vadd.f32 %v744_v28, %v702_v39  ;;  %v2853_v28 = vld [vmem:[%s4030_s8 + $0x118] ss:$28 sps:$4 sm:$0xff]   ;;  %v2871_v36 = vld [vmem:[%s4030_s8 + $0x70] ss:$28 sps:$4 sm:$0xff]   ;;  %v2885_v39 = vld [vmem:[%s4030_s8 + $0x4] ss:$28 sps:$4 sm:$0xff]  }
 0x108   :  { %v705_v41 = vpop.f32.mrf.mxu0  ;;  %v2873_v35 = vld [vmem:[%s4030_s8 + $0x74] ss:$28 sps:$4 sm:$0xff]  }
 0x109   :  { %v748_v37 = vpop.f32.mrf.mxu1  ;;  %v706_v46 = vadd.f32 %v705_v41, %v168_v34  ;;  %v747_v49 = vadd.f32 %v746_v33, %v704_v42  ;;  %v2867_v33 = vld [vmem:[%s4030_s8 + $0xac] ss:$28 sps:$4 sm:$0xff]  }
 0x10a   :  { %v2865_v34 = vld [vmem:[%s4030_s8 + $0xa8] ss:$28 sps:$4 sm:$0xff]  }
 0x10b   :  { %v828_v38 = vpop.f32.mrf.mxu1  ;;  %v749_v54 = vadd.f32 %v748_v37, %v706_v46  ;;  %v2879_v37 = vld [vmem:[%s4030_s8 + $0x3c] ss:$28 sps:$4 sm:$0xff]   ;;  %v2891_v41 = vld [vmem:[%s4030_s8 + $0x34c] ss:$28 sps:$4 sm:$0xff]  }
 0x10c   :  { %v2889_v42 = vld [vmem:[%s4030_s8 + $0x348] ss:$28 sps:$4 sm:$0xff]   ;;  %v2901_v46 = vld [vmem:[%s4030_s8 + $0x2d8] ss:$28 sps:$4 sm:$0xff]  }
 0x10d   :  { %v830_v43 = vpop.f32.mrf.mxu1 }
 0x10f   :  { %v832_v52 = vpop.f32.mrf.mxu1 }
 0x111   :  { %v834_v61 = vpop.f32.mrf.mxu1 }
 0x142   :  { %v785_v44 = vpop.f32.mrf.mxu0 }
 0x143   :  { %v786_v51 = vadd.f32 %v785_v44, %v743_v47  ;;  %v2895_v44 = vld [vmem:[%s4030_s8 + $0x310] ss:$28 sps:$4 sm:$0xff]   ;;  %v2909_v47 = vld [vmem:[%s4030_s8 + $0x2a4] ss:$28 sps:$4 sm:$0xff]  }
 0x144   :  { %v787_v48 = vpop.f32.mrf.mxu0 }
 0x145   :  { %v788_v50 = vadd.f32 %v787_v48, %v745_v45  ;;  %v829_v60 = vadd.f32 %v828_v38, %v786_v51  ;;  %v2877_v38 = vld [vmem:[%s4030_s8 + $0x38] ss:$28 sps:$4 sm:$0xff]   ;;  %v2907_v48 = vld [vmem:[%s4030_s8 + $0x2a0] ss:$28 sps:$4 sm:$0xff]  }
 0x146   :  { %v789_v53 = vpop.f32.mrf.mxu0  ;;  %v2903_v45 = vld [vmem:[%s4030_s8 + $0x2dc] ss:$28 sps:$4 sm:$0xff]   ;;  %v875_v51 = vld [vmem:[%s4027_s5] sm:$0x3] }
 0x147   :  { %v790_v55 = vadd.f32 %v789_v53, %v747_v49  ;;  %v831_v57 = vadd.f32 %v830_v43, %v788_v50  ;;  %v837_v2 = vmax.f32 %v829_v60, 0.0  ;;  %v2897_v43 = vld [vmem:[%s4030_s8 + $0x314] ss:$28 sps:$4 sm:$0xff]   ;;  %v2915_v49 = vld [vmem:[%s4030_s8 + $0x26c] ss:$28 sps:$4 sm:$0xff]   ;;  %v884_v53 = vrot.slane %v875_v51, %v3581_v29 }
 0x148   :  { %v791_v56 = vpop.f32.mrf.mxu0  ;;  %v2913_v50 = vld [vmem:[%s4030_s8 + $0x268] ss:$28 sps:$4 sm:$0xff]  }
 0x149   :  { %v833_v58 = vadd.f32 %v832_v52, %v790_v55  ;;  %v792_v59 = vadd.f32 %v791_v56, %v749_v54  ;;  %v838_v0 = vmax.f32 %v831_v57, 0.0  ;;  %v880_v52 = vrot.slane %v875_v51, %v3587_v31  ;;  %v2939_v51 = vld [vmem:[%s4030_s8 + $0x19c] ss:$28 sps:$4 sm:$0xff]  }
 0x14b   :  { %v835_v62 = vadd.f32 %v834_v61, %v792_v59  ;;  %v839_v63 = vmax.f32 %v833_v58, 0.0 }
 0x14d   :  { %v840_v1 = vmax.f32 %v835_v62, 0.0  ;;  %v841_v4 = vpack.c.bf16 %v839_v63, %v837_v2  ;;  %v1096_v2 = vld [vmem:[%s4023_s1] sm:$0xff] }
 0x14f   :  { %v842_v3 = vpack.c.bf16 %v840_v1, %v838_v0 }
 0x151   :  { %1079 = vmatprep.mubr.bf16.mxu1 %v842_v3 }
 0x152   :  { %1080 = vmatmul.mubr.bf16.vlgmr.msra.gmra.mxu1 %v841_v4 }
 0x153   :  { %2002 = vmatpush1.bf16.msra.mxu1 %v2841_v21  ;;  %v2874_v21 = vld [vmem:[%s4030_s8 + $0x78] ss:$28 sps:$4 sm:$0xff]  }
 0x154   :  { %2003 = vmatprep.subr.bf16.mxu1 %v2849_v24  ;;  %v2888_v24 = vld [vmem:[%s4030_s8 + $0xc] ss:$28 sps:$4 sm:$0xff]  }
 0x157   :  { %2004 = vmatpush1.bf16.msra.mxu1 %v2847_v25  ;;  %v2886_v25 = vld [vmem:[%s4030_s8 + $0x8] ss:$28 sps:$4 sm:$0xff]  }
 0x158   :  { %2005 = vmatprep.subr.bf16.mxu1 %v2855_v27  ;;  %v2894_v27 = vld [vmem:[%s4030_s8 + $0x354] ss:$28 sps:$4 sm:$0xff]  }
 0x15b   :  { %2006 = vmatpush1.bf16.msra.mxu1 %v2853_v28  ;;  %v2892_v28 = vld [vmem:[%s4030_s8 + $0x350] ss:$28 sps:$4 sm:$0xff]  }
 0x15c   :  { %2007 = vmatprep.subr.bf16.mxu1 %v2861_v30  ;;  %v2900_v30 = vld [vmem:[%s4030_s8 + $0x31c] ss:$28 sps:$4 sm:$0xff]  }
 0x15f   :  { %2008 = vmatpush1.bf16.msra.mxu1 %v2859_v32  ;;  %v2898_v32 = vld [vmem:[%s4030_s8 + $0x318] ss:$28 sps:$4 sm:$0xff]  }
 0x160   :  { %2009 = vmatprep.subr.bf16.mxu1 %v2867_v33  ;;  %v2906_v33 = vld [vmem:[%s4030_s8 + $0x2e4] ss:$28 sps:$4 sm:$0xff]  }
 0x163   :  { %2010 = vmatpush1.bf16.msra.mxu1 %v2865_v34  ;;  %v2904_v34 = vld [vmem:[%s4030_s8 + $0x2e0] ss:$28 sps:$4 sm:$0xff]  }
 0x164   :  { %2011 = vmatprep.subr.bf16.mxu1 %v2873_v35  ;;  %v2912_v35 = vld [vmem:[%s4030_s8 + $0x2ac] ss:$28 sps:$4 sm:$0xff]  }
 0x167   :  { %2012 = vmatpush1.bf16.msra.mxu1 %v2871_v36  ;;  %v2910_v36 = vld [vmem:[%s4030_s8 + $0x2a8] ss:$28 sps:$4 sm:$0xff]  }
 0x168   :  { %2013 = vmatprep.subr.bf16.mxu1 %v2879_v37  ;;  %v2918_v37 = vld [vmem:[%s4030_s8 + $0x274] ss:$28 sps:$4 sm:$0xff]  }
 0x16b   :  { %2014 = vmatpush1.bf16.msra.mxu1 %v2877_v38  ;;  %v2916_v38 = vld [vmem:[%s4030_s8 + $0x270] ss:$28 sps:$4 sm:$0xff]  }
 0x16c   :  { %2015 = vmatprep.subr.bf16.mxu1 %v2885_v39  ;;  %v2921_v39 = vld [vmem:[%s4030_s8 + $0x234] ss:$28 sps:$4 sm:$0xff]  }
 0x16f   :  { %2016 = vmatpush1.bf16.msra.mxu1 %v2883_v40  ;;  %v2924_v40 = vld [vmem:[%s4030_s8 + $0x23c] ss:$28 sps:$4 sm:$0xff]  }
 0x170   :  { %2017 = vmatprep.subr.bf16.mxu1 %v2891_v41  ;;  %v2919_v41 = vld [vmem:[%s4030_s8 + $0x230] ss:$28 sps:$4 sm:$0xff]  }
 0x173   :  { %2018 = vmatpush2.bf16.msra.mxu1 %v2889_v42  ;;  %v2922_v42 = vld [vmem:[%s4030_s8 + $0x238] ss:$28 sps:$4 sm:$0xff]  }
 0x174   :  { %2019 = vmatprep.subr.bf16.mxu1 %v2897_v43  ;;  %v2927_v43 = vld [vmem:[%s4030_s8 + $0x1fc] ss:$28 sps:$4 sm:$0xff]  }
 0x177   :  { %2020 = vmatpush2.bf16.msra.mxu1 %v2895_v44  ;;  %v2930_v44 = vld [vmem:[%s4030_s8 + $0x204] ss:$28 sps:$4 sm:$0xff]  }
 0x178   :  { %2021 = vmatprep.subr.bf16.mxu1 %v2903_v45  ;;  %v2925_v45 = vld [vmem:[%s4030_s8 + $0x1f8] ss:$28 sps:$4 sm:$0xff]  }
 0x17b   :  { %2022 = vmatpush2.bf16.msra.mxu1 %v2901_v46  ;;  %v2928_v46 = vld [vmem:[%s4030_s8 + $0x200] ss:$28 sps:$4 sm:$0xff]  }
 0x17c   :  { %2023 = vmatprep.subr.bf16.mxu1 %v2909_v47  ;;  %v2933_v47 = vld [vmem:[%s4030_s8 + $0x1c4] ss:$28 sps:$4 sm:$0xff]  }
 0x17f   :  { %2024 = vmatpush2.bf16.msra.mxu1 %v2907_v48  ;;  %v2936_v48 = vld [vmem:[%s4030_s8 + $0x1cc] ss:$28 sps:$4 sm:$0xff]  }
 0x180   :  { %2025 = vmatprep.subr.bf16.mxu1 %v2915_v49  ;;  %v2931_v49 = vld [vmem:[%s4030_s8 + $0x1c0] ss:$28 sps:$4 sm:$0xff]  }
 0x183   :  { %2026 = vmatpush2.bf16.msra.mxu1 %v2913_v50  ;;  %v2934_v50 = vld [vmem:[%s4030_s8 + $0x1c8] ss:$28 sps:$4 sm:$0xff]  }
 0x184   :  { %2027 = vmatprep.subr.bf16.mxu1 %v2921_v39  ;;  %v2979_v39 = vld [vmem:[%s4030_s8 + $0x35c] ss:$28 sps:$4 sm:$0xff]  }
 0x187   :  { %2028 = vmatpush2.bf16.msra.mxu1 %v2919_v41  ;;  %v2982_v41 = vld [vmem:[%s4030_s8 + $0x324] ss:$28 sps:$4 sm:$0xff]  }
 0x188   :  { %2029 = vmatprep.subr.bf16.mxu1 %v2927_v43  ;;  %v2985_v43 = vld [vmem:[%s4030_s8 + $0x2ec] ss:$28 sps:$4 sm:$0xff]  }
 0x18b   :  { %2030 = vmatpush2.bf16.msra.mxu1 %v2925_v45  ;;  %v2988_v45 = vld [vmem:[%s4030_s8 + $0x2b4] ss:$28 sps:$4 sm:$0xff]  }
 0x18c   :  { %2031 = vmatprep.subr.bf16.mxu1 %v2933_v47  ;;  %v2991_v47 = vld [vmem:[%s4030_s8 + $0x27c] ss:$28 sps:$4 sm:$0xff]  }
 0x18f   :  { %2032 = vmatpush2.bf16.msra.mxu1 %v2931_v49  ;;  %v2994_v49 = vld [vmem:[%s4030_s8 + $0x244] ss:$28 sps:$4 sm:$0xff]  }
 0x190   :  { %2087 = vmatprep.subr.bf16.mxu1 %v2939_v51  ;;  %v2997_v51 = vld [vmem:[%s4030_s8 + $0x20c] ss:$28 sps:$4 sm:$0xff]  }
 0x212   :  { %v1081_v54 = vpop.f32.mrf.mxu1 }
 0x213   :  { %v1082_v55 = vadd.f32 %v1081_v54, %v880_v52 }
 0x214   :  { %v1083_v56 = vpop.f32.mrf.mxu1 }
 0x215   :  { %2227 = vst [vmem:[#allocation2] sm:$0xff] %v1082_v55  ;;  %v1084_v57 = vadd.f32 %v1083_v56, %v884_v53 }
 0x216   :  { %v1085_v58 = vpop.f32.mrf.mxu1 }
 0x217   :  { %v1090_v59 = vmul.f32 0.5, %v1084_v57  ;;  %2229 = vst [vmem:[#allocation2 + $0x8] sm:$0xff] %v1084_v57  ;;  %v1086_v60 = vadd.f32 %v1085_v58, %v880_v52  ;;  %v2940_v52 = vld [vmem:[%s4030_s8 + $0x360] ss:$28 sps:$4 sm:$0xff]  }
 0x218   :  { %v1087_v61 = vpop.f32.mrf.mxu1 }
 0x219   :  { %v1092_v62 = vmul.f32 1.442695, %v1090_v59  ;;  %2228 = vst [vmem:[#allocation2 + $0x18] sm:$0xff] %v1086_v60  ;;  %v1088_v63 = vadd.f32 %v1087_v61, %v884_v53  ;;  %v1119_v53 = vld [vmem:[%s4029_s7] sm:$0x3] }
 0x21a   :  { %v1124_v56 = vrot.slane %v1119_v53, %v3587_v31 }
 0x21b   :  { %3001 = vpow2.f32 %v1092_v62  ;;  %v1091_v0 = vmul.f32 0.5, %v1088_v63  ;;  %2230 = vst [vmem:[#allocation2 + $0x20] sm:$0xff] %v1088_v63 }
 0x21d   :  { %v1094_v1 = vmul.f32 1.442695, %v1091_v0 }
 0x21f   :  { %3003 = vpow2.f32 %v1094_v1 }
 0x228   :  { %v3002_v3 = vpop.eup %3001 }
 0x229   :  { %v1098_v4 = vmul.f32 %v3002_v3, %v1096_v2 }
 0x22b   :  { %v1100_v6 = vadd.f32 %v1098_v4, %v1082_v55  ;;  %v1128_v55 = vrot.slane %v1119_v53, %v3581_v29  ;;  %v3000_v53 = vld [vmem:[%s4030_s8 + $0x1d4] ss:$28 sps:$4 sm:$0xff]  }
 0x22c   :  { %v3004_v7 = vpop.eup %3003 }
 0x22d   :  { %v1099_v8 = vmul.f32 %v3004_v7, %v1097_v5  ;;  %2231 = vst [vmem:[#allocation2 + $0x10] sm:$0xff] %v1100_v6  ;;  %v2937_v5 = vld [vmem:[%s4030_s8 + $0x198] ss:$28 sps:$4 sm:$0xff]  }
 0x22f   :  { %v1101_v9 = vadd.f32 %v1099_v8, %v1086_v60  ;;  %v2944_v8 = vld [vmem:[%s4030_s8 + $0x164] ss:$28 sps:$4 sm:$0xff]  }
 0x231   :  { %v1102_v11 = vpack.c.bf16 %v1101_v9, %v1100_v6  ;;  %2232 = vst [vmem:[#allocation2 + $0x28] sm:$0xff] %v1101_v9  ;;  %v2941_v6 = vld [vmem:[%s4030_s8 + $0x1a0] ss:$28 sps:$4 sm:$0xff]   ;;  %v2945_v9 = vld [vmem:[%s4030_s8 + $0x328] ss:$28 sps:$4 sm:$0xff]  }
 0x233   :  { %1244 = vmatmul.mubr.bf16.vlgmr.msra.gmra.mxu0 %v1102_v11  ;;  %v2946_v11 = vld [vmem:[%s4030_s8 + $0x168] ss:$28 sps:$4 sm:$0xff]  }
 0x234   :  { %2045 = vmatpush1.bf16.msra.mxu0 %v2844_v10  ;;  %v2942_v10 = vld [vmem:[%s4030_s8 + $0x160] ss:$28 sps:$4 sm:$0xff]  }
 0x235   :  { %2046 = vmatprep.subr.bf16.mxu0 %v2852_v12  ;;  %v2949_v12 = vld [vmem:[%s4030_s8 + $0x12c] ss:$28 sps:$4 sm:$0xff]  }
 0x238   :  { %2047 = vmatpush1.bf16.msra.mxu0 %v2850_v13  ;;  %v2950_v13 = vld [vmem:[%s4030_s8 + $0x2f0] ss:$28 sps:$4 sm:$0xff]  }
 0x239   :  { %2048 = vmatprep.subr.bf16.mxu0 %v2858_v14  ;;  %v2947_v14 = vld [vmem:[%s4030_s8 + $0x128] ss:$28 sps:$4 sm:$0xff]  }
 0x23c   :  { %2049 = vmatpush1.bf16.msra.mxu0 %v2856_v15  ;;  %v2951_v15 = vld [vmem:[%s4030_s8 + $0x130] ss:$28 sps:$4 sm:$0xff]  }
 0x23d   :  { %2050 = vmatprep.subr.bf16.mxu0 %v2864_v16  ;;  %v2954_v16 = vld [vmem:[%s4030_s8 + $0xf4] ss:$28 sps:$4 sm:$0xff]  }
 0x240   :  { %2051 = vmatpush1.bf16.msra.mxu0 %v2862_v17  ;;  %v2955_v17 = vld [vmem:[%s4030_s8 + $0x2b8] ss:$28 sps:$4 sm:$0xff]  }
 0x241   :  { %2052 = vmatprep.subr.bf16.mxu0 %v2870_v18  ;;  %v2952_v18 = vld [vmem:[%s4030_s8 + $0xf0] ss:$28 sps:$4 sm:$0xff]  }
 0x244   :  { %2053 = vmatpush1.bf16.msra.mxu0 %v2868_v19  ;;  %v2956_v19 = vld [vmem:[%s4030_s8 + $0xf8] ss:$28 sps:$4 sm:$0xff]  }
 0x245   :  { %2054 = vmatprep.subr.bf16.mxu0 %v2876_v20  ;;  %v2959_v20 = vld [vmem:[%s4030_s8 + $0xbc] ss:$28 sps:$4 sm:$0xff]  }
 0x248   :  { %2055 = vmatpush1.bf16.msra.mxu0 %v2874_v21  ;;  %v2960_v21 = vld [vmem:[%s4030_s8 + $0x280] ss:$28 sps:$4 sm:$0xff]  }
 0x249   :  { %2056 = vmatprep.subr.bf16.mxu0 %v2882_v22  ;;  %v2957_v22 = vld [vmem:[%s4030_s8 + $0xb8] ss:$28 sps:$4 sm:$0xff]  }
 0x24c   :  { %2057 = vmatpush1.bf16.msra.mxu0 %v2880_v23  ;;  %v2961_v23 = vld [vmem:[%s4030_s8 + $0xc0] ss:$28 sps:$4 sm:$0xff]  }
 0x24d   :  { %2058 = vmatprep.subr.bf16.mxu0 %v2888_v24  ;;  %v2964_v24 = vld [vmem:[%s4030_s8 + $0x84] ss:$28 sps:$4 sm:$0xff]  }
 0x250   :  { %2059 = vmatpush1.bf16.msra.mxu0 %v2886_v25  ;;  %v2965_v25 = vld [vmem:[%s4030_s8 + $0x248] ss:$28 sps:$4 sm:$0xff]  }
 0x251   :  { %2060 = vmatprep.subr.bf16.mxu0 %v2894_v27  ;;  %v2962_v27 = vld [vmem:[%s4030_s8 + $0x80] ss:$28 sps:$4 sm:$0xff]  }
 0x254   :  { %2061 = vmatpush2.bf16.msra.mxu0 %v2892_v28  ;;  %v2966_v28 = vld [vmem:[%s4030_s8 + $0x88] ss:$28 sps:$4 sm:$0xff]  }
 0x255   :  { %2062 = vmatprep.subr.bf16.mxu0 %v2900_v30  ;;  %v2969_v30 = vld [vmem:[%s4030_s8 + $0x4c] ss:$28 sps:$4 sm:$0xff]  }
 0x258   :  { %2063 = vmatpush2.bf16.msra.mxu0 %v2898_v32  ;;  %v2970_v32 = vld [vmem:[%s4030_s8 + $0x210] ss:$28 sps:$4 sm:$0xff]  }
 0x259   :  { %2064 = vmatprep.subr.bf16.mxu0 %v2906_v33  ;;  %v2967_v33 = vld [vmem:[%s4030_s8 + $0x48] ss:$28 sps:$4 sm:$0xff]  }
 0x25c   :  { %2065 = vmatpush2.bf16.msra.mxu0 %v2904_v34  ;;  %v2971_v34 = vld [vmem:[%s4030_s8 + $0x50] ss:$28 sps:$4 sm:$0xff]  }
 0x25d   :  { %2066 = vmatprep.subr.bf16.mxu0 %v2912_v35  ;;  %v2974_v35 = vld [vmem:[%s4030_s8 + $0x14] ss:$28 sps:$4 sm:$0xff]  }
 0x260   :  { %2067 = vmatpush2.bf16.msra.mxu0 %v2910_v36  ;;  %v2975_v36 = vld [vmem:[%s4030_s8 + $0x1d8] ss:$28 sps:$4 sm:$0xff]  }
 0x261   :  { %2068 = vmatprep.subr.bf16.mxu0 %v2918_v37  ;;  %v2972_v37 = vld [vmem:[%s4030_s8 + $0x10] ss:$28 sps:$4 sm:$0xff]  }
 0x264   :  { %2069 = vmatpush2.bf16.msra.mxu0 %v2916_v38  ;;  %v2976_v38 = vld [vmem:[%s4030_s8 + $0x18] ss:$28 sps:$4 sm:$0xff]  }
 0x265   :  { %2070 = vmatprep.subr.bf16.mxu0 %v2924_v40  ;;  %v2977_v40 = vld [vmem:[%s4030_s8 + $0x358] ss:$28 sps:$4 sm:$0xff]  }
 0x268   :  { %2071 = vmatpush2.bf16.msra.mxu0 %v2922_v42  ;;  %v2980_v42 = vld [vmem:[%s4030_s8 + $0x320] ss:$28 sps:$4 sm:$0xff]  }
 0x269   :  { %2072 = vmatprep.subr.bf16.mxu0 %v2930_v44  ;;  %v2983_v44 = vld [vmem:[%s4030_s8 + $0x2e8] ss:$28 sps:$4 sm:$0xff]  }
 0x26c   :  { %2073 = vmatpush2.bf16.msra.mxu0 %v2928_v46  ;;  %v2986_v46 = vld [vmem:[%s4030_s8 + $0x2b0] ss:$28 sps:$4 sm:$0xff]  }
 0x26d   :  { %2074 = vmatprep.subr.bf16.mxu0 %v2936_v48  ;;  %v2989_v48 = vld [vmem:[%s4030_s8 + $0x278] ss:$28 sps:$4 sm:$0xff]  }
 0x270   :  { %2075 = vmatpush2.bf16.msra.mxu0 %v2934_v50  ;;  %v2992_v50 = vld [vmem:[%s4030_s8 + $0x240] ss:$28 sps:$4 sm:$0xff]  }
 0x271   :  { %2593 = vmatprep.subr.bf16.mxu0 %v2940_v52  ;;  %v2995_v52 = vld [vmem:[%s4030_s8 + $0x208] ss:$28 sps:$4 sm:$0xff]  }
 0x2f3   :  { %v1245_v54 = vpop.f32.mrf.mxu0 }
 0x2f4   :  { %v1246_v61 = vadd.f32 %v1245_v54, %v1124_v56  ;;  %v2998_v54 = vld [vmem:[%s4030_s8 + $0x1d0] ss:$28 sps:$4 sm:$0xff]  }
 0x2f5   :  { %v1247_v57 = vpop.f32.mrf.mxu0 }
 0x2f6   :  { %v1248_v59 = vadd.f32 %v1247_v57, %v1128_v55  ;;  %v1254_v3 = vmax.f32 %v1246_v61, 0.0 }
 0x2f7   :  { %v1249_v58 = vpop.f32.mrf.mxu0 }
 0x2f8   :  { %v1250_v60 = vadd.f32 %v1249_v58, %v1124_v56  ;;  %v1255_v1 = vmax.f32 %v1248_v59, 0.0 }
 0x2f9   :  { %v1251_v62 = vpop.f32.mrf.mxu0 }
 0x2fa   :  { %v1252_v63 = vadd.f32 %v1251_v62, %v1128_v55  ;;  %v1256_v0 = vmax.f32 %v1250_v60, 0.0 }
 0x2fc   :  { %v1257_v2 = vmax.f32 %v1252_v63, 0.0  ;;  %v3859_v7 = vpack.c.bf16 %v1256_v0, %v1254_v3 }
 0x2fe   :  { %v1259_v4 = vpack.c.bf16 %v1257_v2, %v1255_v1 }
 0x300   :  { %2033 = vmatprep.mubr.bf16.mxu1 %v1259_v4  ;;  %2076 = vmatprep.mubr.bf16.mxu0 %v1259_v4 }
 0x301   :  { %2034 = vmatmul.mubr.bf16.vlgmr.msra.gmra.mxu1 %v3859_v7  ;;  %2077 = vmatmul.mubr.bf16.vlgmr.msra.gmra.mxu0 %v3859_v7 }
 0x302   :  { %2088 = vmatpush1.bf16.msra.mxu1 %v2937_v5  ;;  %2594 = vmatpush3.bf16.msra.mxu0 %v2941_v6 }
 0x303   :  { %2119 = vmatprep.mubr.bf16.mxu1 %v1259_v4  ;;  %2162 = vmatprep.mubr.bf16.mxu0 %v1259_v4 }
 0x304   :  { %2089 = vmatprep.subr.bf16.mxu1 %v2944_v8  ;;  %2595 = vmatprep.subr.bf16.mxu0 %v2945_v9 }
 0x306   :  { %2090 = vmatpush1.bf16.msra.mxu1 %v2942_v10  ;;  %2596 = vmatpush3.bf16.msra.mxu0 %v2946_v11 }
 0x307   :  { %2091 = vmatprep.subr.bf16.mxu1 %v2949_v12  ;;  %2597 = vmatprep.subr.bf16.mxu0 %v2950_v13 }
 0x30a   :  { %2092 = vmatpush1.bf16.msra.mxu1 %v2947_v14  ;;  %2598 = vmatpush3.bf16.msra.mxu0 %v2951_v15 }
 0x30b   :  { %2093 = vmatprep.subr.bf16.mxu1 %v2954_v16  ;;  %2599 = vmatprep.subr.bf16.mxu0 %v2955_v17 }
 0x30e   :  { %2094 = vmatpush1.bf16.msra.mxu1 %v2952_v18  ;;  %2600 = vmatpush3.bf16.msra.mxu0 %v2956_v19 }
 0x30f   :  { %2095 = vmatprep.subr.bf16.mxu1 %v2959_v20  ;;  %2601 = vmatprep.subr.bf16.mxu0 %v2960_v21 }
 0x312   :  { %2096 = vmatpush1.bf16.msra.mxu1 %v2957_v22  ;;  %2602 = vmatpush3.bf16.msra.mxu0 %v2961_v23 }
 0x313   :  { %2097 = vmatprep.subr.bf16.mxu1 %v2964_v24  ;;  %2603 = vmatprep.subr.bf16.mxu0 %v2965_v25 }
 0x316   :  { %2098 = vmatpush1.bf16.msra.mxu1 %v2962_v27  ;;  %2604 = vmatpush3.bf16.msra.mxu0 %v2966_v28 }
 0x317   :  { %2099 = vmatprep.subr.bf16.mxu1 %v2969_v30  ;;  %2605 = vmatprep.subr.bf16.mxu0 %v2970_v32 }
 0x31a   :  { %2100 = vmatpush1.bf16.msra.mxu1 %v2967_v33  ;;  %2606 = vmatpush3.bf16.msra.mxu0 %v2971_v34 }
 0x31b   :  { %2101 = vmatprep.subr.bf16.mxu1 %v2974_v35  ;;  %2607 = vmatprep.subr.bf16.mxu0 %v2975_v36 }
 0x31e   :  { %2102 = vmatpush1.bf16.msra.mxu1 %v2972_v37  ;;  %2608 = vmatpush3.bf16.msra.mxu0 %v2976_v38 }
 0x31f   :  { %2103 = vmatprep.subr.bf16.mxu1 %v2979_v39 }
 0x321   :  { %2163 = vmatmul.mubr.bf16.vlgmr.msra.gmra.mxu0 %v3859_v7 }
 0x322   :  { %2104 = vmatpush2.bf16.msra.mxu1 %v2977_v40 }
 0x323   :  { %2105 = vmatprep.subr.bf16.mxu1 %v2982_v41 }
 0x326   :  { %2106 = vmatpush2.bf16.msra.mxu1 %v2980_v42 }
 0x327   :  { %2107 = vmatprep.subr.bf16.mxu1 %v2985_v43 }
 0x32a   :  { %2108 = vmatpush2.bf16.msra.mxu1 %v2983_v44 }
 0x32b   :  { %2109 = vmatprep.subr.bf16.mxu1 %v2988_v45 }
 0x32e   :  { %2110 = vmatpush2.bf16.msra.mxu1 %v2986_v46 }
 0x32f   :  { %2111 = vmatprep.subr.bf16.mxu1 %v2991_v47 }
 0x332   :  { %2112 = vmatpush2.bf16.msra.mxu1 %v2989_v48 }
 0x333   :  { %2113 = vmatprep.subr.bf16.mxu1 %v2994_v49 }
 0x336   :  { %2114 = vmatpush2.bf16.msra.mxu1 %v2992_v50 }
 0x337   :  { %2115 = vmatprep.subr.bf16.mxu1 %v2997_v51 }
 0x33a   :  { %2116 = vmatpush2.bf16.msra.mxu1 %v2995_v52 }
 0x33b   :  { %2117 = vmatprep.subr.bf16.mxu1 %v3000_v53 }
 0x33e   :  { %2118 = vmatpush2.bf16.msra.mxu1 %v2998_v54 }
 0x341   :  { %2120 = vmatmul.mubr.bf16.vlgmr.msra.gmra.mxu1 %v3859_v7 }
 0x342   :  { %3044 = shalt.err (!%p3041_p4)
}
 0x343   :  { %s3079_s22 = smov 384   ;;  %s3080_s23 = smov 24   ;;  %v1400_v55 = vsub.s32 2, %v3578_v26  ;;  %v4004_v56 = vld [vmem:[%s4031_s9] sm:$0x7f]  ;;  %v1404_v57 = vsub.s32 3, %v3578_v26 }
 0x344   :  { %2297 = dma.vmem_to_hbm [thread:$0]  %s2292_s20, 768, %s4032_s10, [#allocation3], %s3079_s22, %s3079_s22, %s3080_s23   ;;  %v1393_v58 = vrot.slane %v4004_v56, %v3587_v31  ;;  %v1397_v60 = vrot.slane %v4004_v56, %v3581_v29  ;;  %v1416_v50 = vsub.s32 6, %v3578_v26  ;;  %vm2280_vm1 = vcmask 125952  }
 0x345   :  { %v1401_v59 = vrot.slane %v4004_v56, %v1400_v55  ;;  %v1405_v61 = vrot.slane %v4004_v56, %v1404_v57  ;;  %s3081_s9 = smov [#allocation4]  }
 0x346   :  { %v1417_v53 = vrot.slane %v4004_v56, %v1416_v50  ;;  %s2303_s10 = sshll.u32 %s3081_s9, 4  ;;  %s2304_s10 = int_to_ptr.vmem [resolvable:$true] %s2303_s10 }
 0x347   :  { %s3053_s27 = scalar_lea.vmem %s2304_s10, 896  ;;  %p3058_p6 = scmp.lt.s32.totalorder %s2304_s10, %s2304_s10 }
 0x348   :  { %p3054_p5 = scmp.ne.s32.totalorder %s2304_s10, %s3053_s27  ;;  %p3059_p7 = scmp.lt.s32.totalorder %s3053_s27, %s3053_s27 }
 0x34a   :  { %p3060_p8 = por %p3059_p7, %p3058_p6 }
 0x34c   :  { %p3061_p9 = pnand %p3060_p8, %p3054_p5 }
 0x3c1   :  { %v2035_v62 = vpop.f32.mrf.mxu1  ;;  %v2078_v63 = vpop.f32.mrf.mxu0 }
 0x3c2   :  { %v2036_v0 = vadd.f32 %v2035_v62, %v1393_v58  ;;  %v2079_v1 = vadd.f32 %v2078_v63, %v1401_v59 }
 0x3c3   :  { %v2037_v2 = vpop.f32.mrf.mxu1  ;;  %v2080_v3 = vpop.f32.mrf.mxu0 }
 0x3c4   :  { %v2171_v4 = vmul.f32 0.5, %v2036_v0  ;;  %v2173_v5 = vmul.f32 0.5, %v2079_v1  ;;  %v2038_v6 = vadd.f32 %v2037_v2, %v1397_v60  ;;  %v2081_v7 = vadd.f32 %v2080_v3, %v1405_v61 }
 0x3c5   :  { %v2039_v8 = vpop.f32.mrf.mxu1  ;;  %v2082_v9 = vpop.f32.mrf.mxu0  ;;  %v1408_v3 = vsub.s32 4, %v3578_v26 }
 0x3c6   :  { %3005 = vtanh.f32 %v2171_v4  ;;  %v2172_v31 = vmul.f32 0.5, %v2038_v6  ;;  %v2174_v10 = vmul.f32 0.5, %v2081_v7  ;;  %v2040_v11 = vadd.f32 %v2039_v8, %v1393_v58 }
 0x3c7   :  { %3007 = vtanh.f32 %v2173_v5  ;;  %v2083_v29 = vadd.f32 %v2082_v9, %v1401_v59  ;;  %v2041_v12 = vpop.f32.mrf.mxu1  ;;  %v2084_v13 = vpop.f32.mrf.mxu0  ;;  %v1412_v7 = vsub.s32 5, %v3578_v26  ;;  %v1409_v9 = vrot.slane %v4004_v56, %v1408_v3 }
 0x3c8   :  { %3009 = vtanh.f32 %v2172_v31  ;;  %v2178_v14 = vmul.f32 0.5, %v2040_v11  ;;  %v2042_v15 = vadd.f32 %v2041_v12, %v1397_v60  ;;  %v2085_v16 = vadd.f32 %v2084_v13, %v1405_v61 }
 0x3c9   :  { %3011 = vtanh.f32 %v2174_v10  ;;  %v2180_v17 = vmul.f32 0.5, %v2083_v29  ;;  %v1413_v10 = vrot.slane %v4004_v56, %v1412_v7 }
 0x3ca   :  { %3013 = vtanh.f32 %v2178_v14  ;;  %v2179_v18 = vmul.f32 0.5, %v2042_v15  ;;  %v2181_v19 = vmul.f32 0.5, %v2085_v16 }
 0x3cb   :  { %3015 = vtanh.f32 %v2180_v17 }
 0x3cc   :  { %3017 = vtanh.f32 %v2179_v18 }
 0x3cd   :  { %3019 = vtanh.f32 %v2181_v19 }
 0x3d3   :  { %v3006_v20 = vpop.eup %3005 }
 0x3d4   :  { %v3008_v21 = vpop.eup %3007  ;;  %v2199_v22 = vmul.f32 0.5, %v3006_v20 }
 0x3d5   :  { %v3010_v23 = vpop.eup %3009  ;;  %v2201_v24 = vmul.f32 0.5, %v3008_v21 }
 0x3d6   :  { %v3012_v25 = vpop.eup %3011  ;;  %v2200_v27 = vmul.f32 0.5, %v3010_v23  ;;  %v2213_v33 = vadd.f32 0.5, %v2199_v22 }
 0x3d7   :  { %v3014_v28 = vpop.eup %3013  ;;  %v2202_v30 = vmul.f32 0.5, %v3012_v25  ;;  %v2215_v37 = vadd.f32 0.5, %v2201_v24 }
 0x3d8   :  { %v3016_v32 = vpop.eup %3015  ;;  %v2214_v34 = vadd.f32 0.5, %v2200_v27  ;;  %v2206_v35 = vmul.f32 0.5, %v3014_v28 }
 0x3d9   :  { %v3018_v36 = vpop.eup %3017  ;;  %v2216_v38 = vadd.f32 0.5, %v2202_v30  ;;  %v2208_v39 = vmul.f32 0.5, %v3016_v32 }
 0x3da   :  { %v3020_v40 = vpop.eup %3019  ;;  %v2585_v41 = vpack.c.bf16 %v2214_v34, %v2213_v33  ;;  %v2207_v42 = vmul.f32 0.5, %v3018_v36  ;;  %v2220_v45 = vadd.f32 0.5, %v2206_v35 }
 0x3db   :  { %v2586_v43 = vpack.c.bf16 %v2216_v38, %v2215_v37  ;;  %v2209_v44 = vmul.f32 0.5, %v3020_v40  ;;  %v2222_v47 = vadd.f32 0.5, %v2208_v39 }
 0x3dc   :  { %2277 = vst [vmem:[#allocation4] sm:$0xff] %v2585_v41  ;;  %v2221_v46 = vadd.f32 0.5, %v2207_v42 }
 0x3dd   :  { %2278 = vst [vmem:[#allocation4 + $0x8] sm:$0xff] %v2586_v43  ;;  %v2223_v48 = vadd.f32 0.5, %v2209_v44 }
 0x3de   :  { %v2589_v49 = vpack.c.bf16 %v2221_v46, %v2220_v45 }
 0x3df   :  { %v2590_v51 = vpack.c.bf16 %v2223_v48, %v2222_v47 }
 0x3e0   :  { %2282 = vst [vmem:[#allocation4 + $0x1c] sm:$0xff] %v2589_v49 }
 0x3e1   :  { %2283 = vst [vmem:[#allocation4 + $0x24] sm:$0xff] %v2590_v51  ;;  %v2609_v52 = vpop.f32.mrf.mxu0 }
 0x3e3   :  { %v2610_v54 = vpop.f32.mrf.mxu0 }
 0x3e4   :  { %v2611_v55 = vadd.f32 %v2610_v54, %v2609_v52 }
 0x3e5   :  { %v2612_v57 = vpop.f32.mrf.mxu0 }
 0x3e6   :  { %v2165_v58 = vadd.f32 %v2611_v55, %v1417_v53 }
 0x3e7   :  { %v2613_v59 = vpop.f32.mrf.mxu0 }
 0x3e8   :  { %v2177_v60 = vmul.f32 0.5, %v2165_v58  ;;  %v2614_v61 = vadd.f32 %v2613_v59, %v2612_v57 }
 0x3ea   :  { %3021 = vtanh.f32 %v2177_v60  ;;  %v2168_v62 = vadd.f32 %v2614_v61, %v1417_v53 }
 0x3ec   :  { %v2184_v63 = vmul.f32 0.5, %v2168_v62 }
 0x3ee   :  { %3023 = vtanh.f32 %v2184_v63 }
 0x3f7   :  { %v3022_v0 = vpop.eup %3021 }
 0x3f8   :  { %v2205_v1 = vmul.f32 0.5, %v3022_v0 }
 0x3fa   :  { %v2219_v2 = vadd.f32 0.5, %v2205_v1 }
 0x3fb   :  { %v3024_v4 = vpop.eup %3023 }
 0x3fc   :  { %v2588_v5 = vpack.c.bf16 %v2219_v2, %v2219_v2  ;;  %v2212_v6 = vmul.f32 0.5, %v3024_v4 }
 0x3fe   :  { %2281 = vst.msk [vmem:[#allocation4 + $0x18] sm:$0xf] %vm2280_vm1, %v2588_v5  ;;  %v2226_v8 = vadd.f32 0.5, %v2212_v6 }
 0x400   :  { %v2592_v31 = vpack.c.bf16 %v2226_v8, %v2226_v8 }
 0x401   :  { %v2121_v11 = vpop.f32.mrf.mxu1 }
 0x402   :  { %2285 = vst.msk [vmem:[#allocation4 + $0x34] sm:$0xf] %vm2280_vm1, %v2592_v31  ;;  %v2122_v29 = vadd.f32 %v2121_v11, %v1409_v9 }
 0x403   :  { %v2123_v12 = vpop.f32.mrf.mxu1 }
 0x404   :  { %v2175_v13 = vmul.f32 0.5, %v2122_v29  ;;  %v2124_v14 = vadd.f32 %v2123_v12, %v1413_v10 }
 0x405   :  { %v2125_v15 = vpop.f32.mrf.mxu1 }
 0x406   :  { %3025 = vtanh.f32 %v2175_v13  ;;  %v2176_v16 = vmul.f32 0.5, %v2124_v14  ;;  %v2126_v17 = vadd.f32 %v2125_v15, %v1409_v9 }
 0x407   :  { %v2127_v18 = vpop.f32.mrf.mxu1 }
 0x408   :  { %3027 = vtanh.f32 %v2176_v16  ;;  %v2182_v26 = vmul.f32 0.5, %v2126_v17  ;;  %v2128_v19 = vadd.f32 %v2127_v18, %v1413_v10 }
 0x40a   :  { %3029 = vtanh.f32 %v2182_v26  ;;  %v2183_v20 = vmul.f32 0.5, %v2128_v19 }
 0x40c   :  { %3031 = vtanh.f32 %v2183_v20 }
 0x413   :  { %v3026_v21 = vpop.eup %3025 }
 0x414   :  { %v2203_v22 = vmul.f32 0.5, %v3026_v21 }
 0x415   :  { %v3028_v56 = vpop.eup %3027 }
 0x416   :  { %v2204_v23 = vmul.f32 0.5, %v3028_v56  ;;  %v2217_v25 = vadd.f32 0.5, %v2203_v22 }
 0x417   :  { %v3030_v24 = vpop.eup %3029 }
 0x418   :  { %v2218_v27 = vadd.f32 0.5, %v2204_v23  ;;  %v2210_v28 = vmul.f32 0.5, %v3030_v24 }
 0x419   :  { %v3032_v30 = vpop.eup %3031 }
 0x41a   :  { %v2587_v32 = vpack.c.bf16 %v2218_v27, %v2217_v25  ;;  %v2211_v33 = vmul.f32 0.5, %v3032_v30  ;;  %v2224_v34 = vadd.f32 0.5, %v2210_v28 }
 0x41c   :  { %2279 = vst [vmem:[#allocation4 + $0x10] sm:$0xff] %v2587_v32  ;;  %v2225_v35 = vadd.f32 0.5, %v2211_v33 }
 0x41e   :  { %v2591_v36 = vpack.c.bf16 %v2225_v35, %v2224_v34 }
 0x420   :  { %2284 = vst [vmem:[#allocation4 + $0x2c] sm:$0xff] %v2591_v36 }
 0x421   :  { %3064 = shalt.err (!%p3061_p9)
}
 0x422   :  { %s3082_s28 = smov 448   ;;  %s3083_s5 = smov 28  }
 0x423   :  { %2309 = dma.vmem_to_hbm [thread:$0]  %s2304_s10, 896, %s4033_s11, [#allocation5], %s3082_s28, %s3082_s28, %s3083_s5  }
 0x424   :  { %3073 = dma.done.wait [#allocation3], 768  }
 0x425   :  { %3074 = vsyncadd [#allocation3], 4294966528 }
 0x426   :  { %3075 = dma.done.wait [#allocation5], 896  }
 0x427   :  { %3076 = vsyncadd [#allocation5], 4294966400 }
 0x428   :  { %2316 = vsyncpa [#allocation3], 1 }
 0x429   :  { %2317 = vsyncpa [#allocation5], 1 }

</bundles_post_ra>
